<compile_context>
chip_gen: v5e
topology: v5e:2x2
jax: 0.10.0
libtpu: 0.0.40
codegen_flags: <defaults>
</compile_context>

<pallas_src>
import numpy as np
import jax
import jax.numpy as jnp
from jax.experimental import pallas as pl
from jax.experimental.pallas import tpu as pltpu

_VMEM_SPEC = pl.BlockSpec(memory_space=pltpu.MemorySpace.VMEM)


# ----------------------------- fused Pallas kernel -----------------------------

def net_kernel(patches1_ref,   # (64, 32)  im2col of the input, K padded 27 -> 32
               w1c_ref,        # (32, 128) block1 combined weight [main | skip], BN scale folded
               b1c_ref,        # (1, 128)  block1 combined bias   [main | skip]
               sel2_ref,       # (144, 64) block2 tap-selection matrices (9 taps x 16 positions)
               w2c_ref,        # (9, 64, 256) block2 per-tap combined weight [main | skip@tap4]
               b2c_ref,        # (1, 256)  block2 combined bias   [main | skip]
               wf1_ref,        # (128, 64) fc1
               bf1_ref,        # (1, 64)
               wf2_ref,        # (64, 1)   fc2
               bf2_ref,        # (1, 1)
               out_ref):       # (1, 1)
    # ---- block 1: merged 3x3-main + 1x1-skip conv, one (64,32)x(32,128) MXU matmul ----
    z1 = jnp.dot(patches1_ref[...], w1c_ref[...],
                 preferred_element_type=jnp.float32) + b1c_ref[...]        # (64, 128)
    main1 = jnp.maximum(z1[:, :64], 0.0)     # conv3x3 + BN + ReLU
    skip1 = z1[:, 64:]                       # conv1x1(stride2) + BN (no inner ReLU!)
    act1 = jnp.maximum(main1 + skip1, 0.0)   # (64 spatial, 64 ch) — stays on-chip

    # ---- block 2: in-kernel im2col via selection matmul on the resident act1 ----
    # g[16*t + r, :] = act1 row at the (stride-2, pad-1) tap t of output position r (0 if padded)
    g = jnp.dot(sel2_ref[...], act1, preferred_element_type=jnp.float32)   # (144, 64)
    acc2 = jnp.zeros((16, 256), jnp.float32)
    for t in range(9):   # static unroll; tap 4 (center) also carries the skip conv in lanes 128:
        acc2 = acc2 + jnp.dot(g[16 * t:16 * (t + 1), :], w2c_ref[t],
                              preferred_element_type=jnp.float32)
    acc2 = acc2 + b2c_ref[...]
    main2 = jnp.maximum(acc2[:, :128], 0.0)
    skip2 = acc2[:, 128:]
    act2 = jnp.maximum(main2 + skip2, 0.0)   # (16 spatial, 128 ch)

    # nn.Dropout2d in eval mode is identity.
    # TODO(synk): training-mode channel dropout (random per-channel zeroing) not modeled.

    # ---- head: global-average-pool as matmul, fc1 + ReLU, fc2, analytic quantum layer ----
    pool_vec = jnp.full((1, 16), 1.0 / 16.0, dtype=jnp.float32)
    pooled = jnp.dot(pool_vec, act2, preferred_element_type=jnp.float32)   # (1, 128)
    h = jnp.maximum(jnp.dot(pooled, wf1_ref[...],
                            preferred_element_type=jnp.float32) + bf1_ref[...], 0.0)
    z = jnp.dot(h, wf2_ref[...], preferred_element_type=jnp.float32) + bf2_ref[...]
    # Hybrid: |0> -H-> RY(z) -> measure; E[bit] = (1 + sin z) / 2 (analytic, not shot-sampled)
    out_ref[...] = 0.5 * (1.0 + jnp.sin(z))


# ----------------------------- wrapper --------------------------------------

@jax.jit
def forward(params, x_nhwc):
    # im2col of the tiny (1, 16, 16, 3) input for block1 (pure layout glue; FLOPs are in-kernel)
    _, H, W, cin = x_nhwc.shape
    ho, wo = H // 2, W // 2
    xp = jnp.pad(x_nhwc, ((0, 0), (1, 1), (1, 1), (0, 0)))
    taps = [xp[:, ky:ky + 2 * ho:2, kx:kx + 2 * wo:2, :]
            for ky in range(3) for kx in range(3)]
    patches = jnp.concatenate(taps, axis=-1).reshape(ho * wo, 9 * cin)     # (64, 27)
    patches = jnp.pad(patches, ((0, 0), (0, 32 - 9 * cin)))                # K 27 -> 32 (aligned)

    out = pl.pallas_call(
        net_kernel,
        out_shape=jax.ShapeDtypeStruct((1, 1), jnp.float32),
        in_specs=[_VMEM_SPEC] * 10,
        out_specs=_VMEM_SPEC,
    )(patches,
      params["w1c"], params["b1c"],
      params["sel2"], params["w2c"], params["b2c"],
      params["w_fc1"], params["b_fc1"], params["w_fc2"], params["b_fc2"])
    return out.reshape(-1)   # x.flatten() -> shape (1,)


# ----------------------------- parameters ------------------------------------

def init_params(key):
    keys = jax.random.split(key, 12)

    def conv_w(k, kh, kw, cin, cout):
        fan_in = float(kh * kw * cin)
        return jax.random.normal(k, (kh, kw, cin, cout), jnp.float32) / np.sqrt(fan_in)

    def bn_fold(k, c):
        # eval-mode BatchNorm folded into per-channel scale / bias
        kg, kb, km = jax.random.split(k, 3)
        gamma = 1.0 + 0.1 * jax.random.normal(kg, (c,), jnp.float32)
        beta = 0.1 * jax.random.normal(kb, (c,), jnp.float32)
        mean = 0.1 * jax.random.normal(km, (c,), jnp.float32)
        var = jnp.ones((c,), jnp.float32)
        s = gamma / jnp.sqrt(var + 1e-5)
        b = beta - mean * s
        return s, b

    # ----- block 1: 3 -> 64, stride 2 -----
    w_m1 = conv_w(keys[0], 3, 3, 3, 64)                       # (ky, kx, cin, cout)
    s_m1, b_m1 = bn_fold(keys[1], 64)
    w_s1 = conv_w(keys[2], 1, 1, 3, 64).reshape(3, 64)
    s_s1, b_s1 = bn_fold(keys[3], 64)

    w_m1f = (w_m1 * s_m1).reshape(27, 64)                     # BN scale folded into weights
    w_m1f = jnp.pad(w_m1f, ((0, 5), (0, 0)))                  # K 27 -> 32
    # skip (1x1 stride-2) == center tap (ky=1, kx=1) of the im2col -> rows 4*cin : 5*cin
    w_s1f = jnp.zeros((32, 64), jnp.float32).at[12:15, :].set(w_s1 * s_s1)
    w1c = jnp.concatenate([w_m1f, w_s1f], axis=1)             # (32, 128)
    b1c = jnp.concatenate([b_m1, b_s1]).reshape(1, 128)

    # ----- block 2: 64 -> 128, stride 2 -----
    w_m2 = conv_w(keys[4], 3, 3, 64, 128)
    s_m2, b_m2 = bn_fold(keys[5], 128)
    w_s2 = conv_w(keys[6], 1, 1, 64, 128).reshape(64, 128)
    s_s2, b_s2 = bn_fold(keys[7], 128)

    w2c = jnp.zeros((9, 64, 256), jnp.float32)
    w2c = w2c.at[:, :, :128].set((w_m2 * s_m2).reshape(9, 64, 128))   # main conv, per tap
    w2c = w2c.at[4, :, 128:].set(w_s2 * s_s2)                         # skip conv on center tap
    b2c = jnp.concatenate([b_m2, b_s2]).reshape(1, 256)

    # block-2 tap selection matrices: gather-as-matmul for the pad=1 / stride-2 3x3 im2col
    sel = np.zeros((9, 16, 64), np.float32)
    for ky in range(3):
        for kx in range(3):
            t = ky * 3 + kx
            for oy in range(4):
                for ox in range(4):
                    iy, ix = 2 * oy + ky - 1, 2 * ox + kx - 1
                    if 0 <= iy < 8 and 0 <= ix < 8:
                        sel[t, oy * 4 + ox, iy * 8 + ix] = 1.0
    sel2 = jnp.asarray(sel.reshape(144, 64))

    # ----- head -----
    head = {
        "w_fc1": jax.random.normal(keys[8], (128, 64), jnp.float32) / np.sqrt(128.0),
        "b_fc1": 0.01 * jax.random.normal(keys[9], (1, 64), jnp.float32),
        "w_fc2": jax.random.normal(keys[10], (64, 1), jnp.float32) / np.sqrt(64.0),
        "b_fc2": 0.01 * jax.random.normal(keys[11], (1, 1), jnp.float32),
    }
    # NOTE: Net.__init__ defines fc3 = Linear(1, 1) but never uses it in forward(); omitted.
    return {"w1c": w1c, "b1c": b1c, "sel2": sel2, "w2c": w2c, "b2c": b2c, **head}


# ----------------------------- main -------------------------------------------

if __name__ == "__main__":
    key = jax.random.PRNGKey(0)
    pkey, xkey = jax.random.split(key)
    params = init_params(pkey)

    # PyTorch-style NCHW input (batch must be 1 because of x.view(1, -1) + fc1(128, 64))
    x_nchw = jax.random.normal(xkey, (1, 3, 16, 16), jnp.float32)
    x_nhwc = jnp.transpose(x_nchw, (0, 2, 3, 1))

    y = forward(params, x_nhwc)
    jax.block_until_ready(y)
    assert y.shape == (1,)
    assert bool(jnp.all(jnp.isfinite(y)))
    print("KERNEL_OK")
</pallas_src>

<mosaic_0001>
module attributes {stable_mosaic.version = 11 : i64} {
  func.func @net_kernel(%arg0: memref<64x32xf32, #tpu.memory_space<vmem>>, %arg1: memref<32x128xf32, #tpu.memory_space<vmem>>, %arg2: memref<1x128xf32, #tpu.memory_space<vmem>>, %arg3: memref<144x64xf32, #tpu.memory_space<vmem>>, %arg4: memref<9x64x256xf32, #tpu.memory_space<vmem>>, %arg5: memref<1x256xf32, #tpu.memory_space<vmem>>, %arg6: memref<128x64xf32, #tpu.memory_space<vmem>>, %arg7: memref<1x64xf32, #tpu.memory_space<vmem>>, %arg8: memref<64x1xf32, #tpu.memory_space<vmem>>, %arg9: memref<1x1xf32, #tpu.memory_space<vmem>>, %arg10: memref<1x1xf32, #tpu.memory_space<vmem>>) attributes {dimension_semantics = [], scalar_prefetch = 0 : i64, scratch_operands = 0 : i64, tpu.core_type = #tpu.core_type<tc>} {
    %c0 = arith.constant 0 : index
    %c0_0 = arith.constant 0 : index
    %0 = vector.load %arg0[%c0, %c0_0] : memref<64x32xf32, #tpu.memory_space<vmem>>, vector<64x32xf32>
    %c0_1 = arith.constant 0 : index
    %c0_2 = arith.constant 0 : index
    %1 = vector.load %arg1[%c0_1, %c0_2] : memref<32x128xf32, #tpu.memory_space<vmem>>, vector<32x128xf32>
    %cst = arith.constant dense<0.000000e+00> : vector<64x128xf32>
    %2 = tpu.matmul %0, %1, %cst {dimension_numbers = #tpu.dot_dimension_numbers<[1], [0], [0], [1], [0, 0, 1, 1], [], []>} : vector<64x32xf32>, vector<32x128xf32>, vector<64x128xf32> -> vector<64x128xf32>
    %c0_3 = arith.constant 0 : index
    %c0_4 = arith.constant 0 : index
    %3 = vector.load %arg2[%c0_3, %c0_4] : memref<1x128xf32, #tpu.memory_space<vmem>>, vector<1x128xf32>
    %4 = vector.broadcast %3 : vector<1x128xf32> to vector<64x128xf32>
    %5 = arith.addf %2, %4 : vector<64x128xf32>
    %6 = vector.extract_strided_slice %5 {offsets = [0, 0], sizes = [64, 64], strides = [1, 1]} : vector<64x128xf32> to vector<64x64xf32>
    %cst_5 = arith.constant 0.000000e+00 : f32
    %7 = vector.broadcast %cst_5 : f32 to vector<64x64xf32>
    %8 = arith.maximumf %6, %7 : vector<64x64xf32>
    %9 = vector.extract_strided_slice %5 {offsets = [0, 64], sizes = [64, 64], strides = [1, 1]} : vector<64x128xf32> to vector<64x64xf32>
    %10 = arith.addf %8, %9 : vector<64x64xf32>
    %cst_6 = arith.constant 0.000000e+00 : f32
    %11 = vector.broadcast %cst_6 : f32 to vector<64x64xf32>
    %12 = arith.maximumf %10, %11 : vector<64x64xf32>
    %c0_7 = arith.constant 0 : index
    %c0_8 = arith.constant 0 : index
    %13 = vector.load %arg3[%c0_7, %c0_8] : memref<144x64xf32, #tpu.memory_space<vmem>>, vector<144x64xf32>
    %cst_9 = arith.constant dense<0.000000e+00> : vector<144x64xf32>
    %14 = tpu.matmul %13, %12, %cst_9 {dimension_numbers = #tpu.dot_dimension_numbers<[1], [0], [0], [1], [0, 0, 1, 1], [], []>} : vector<144x64xf32>, vector<64x64xf32>, vector<144x64xf32> -> vector<144x64xf32>
    %cst_10 = arith.constant 0.000000e+00 : f32
    %15 = vector.broadcast %cst_10 : f32 to vector<16x256xf32>
    %16 = vector.extract_strided_slice %14 {offsets = [0, 0], sizes = [16, 64], strides = [1, 1]} : vector<144x64xf32> to vector<16x64xf32>
    %c0_11 = arith.constant 0 : index
    %c0_12 = arith.constant 0 : index
    %c0_13 = arith.constant 0 : index
    %17 = vector.load %arg4[%c0_11, %c0_12, %c0_13] : memref<9x64x256xf32, #tpu.memory_space<vmem>>, vector<1x64x256xf32>
    %18 = vector.shape_cast %17 : vector<1x64x256xf32> to vector<64x256xf32>
    %cst_14 = arith.constant dense<0.000000e+00> : vector<16x256xf32>
    %19 = tpu.matmul %16, %18, %cst_14 {dimension_numbers = #tpu.dot_dimension_numbers<[1], [0], [0], [1], [0, 0, 1, 1], [], []>} : vector<16x64xf32>, vector<64x256xf32>, vector<16x256xf32> -> vector<16x256xf32>
    %20 = arith.addf %15, %19 : vector<16x256xf32>
    %21 = vector.extract_strided_slice %14 {offsets = [16, 0], sizes = [16, 64], strides = [1, 1]} : vector<144x64xf32> to vector<16x64xf32>
    %c1 = arith.constant 1 : index
    %c0_15 = arith.constant 0 : index
    %c0_16 = arith.constant 0 : index
    %22 = vector.load %arg4[%c1, %c0_15, %c0_16] : memref<9x64x256xf32, #tpu.memory_space<vmem>>, vector<1x64x256xf32>
    %23 = vector.shape_cast %22 : vector<1x64x256xf32> to vector<64x256xf32>
    %cst_17 = arith.constant dense<0.000000e+00> : vector<16x256xf32>
    %24 = tpu.matmul %21, %23, %cst_17 {dimension_numbers = #tpu.dot_dimension_numbers<[1], [0], [0], [1], [0, 0, 1, 1], [], []>} : vector<16x64xf32>, vector<64x256xf32>, vector<16x256xf32> -> vector<16x256xf32>
    %25 = arith.addf %20, %24 : vector<16x256xf32>
    %26 = vector.extract_strided_slice %14 {offsets = [32, 0], sizes = [16, 64], strides = [1, 1]} : vector<144x64xf32> to vector<16x64xf32>
    %c2 = arith.constant 2 : index
    %c0_18 = arith.constant 0 : index
    %c0_19 = arith.constant 0 : index
    %27 = vector.load %arg4[%c2, %c0_18, %c0_19] : memref<9x64x256xf32, #tpu.memory_space<vmem>>, vector<1x64x256xf32>
    %28 = vector.shape_cast %27 : vector<1x64x256xf32> to vector<64x256xf32>
    %cst_20 = arith.constant dense<0.000000e+00> : vector<16x256xf32>
    %29 = tpu.matmul %26, %28, %cst_20 {dimension_numbers = #tpu.dot_dimension_numbers<[1], [0], [0], [1], [0, 0, 1, 1], [], []>} : vector<16x64xf32>, vector<64x256xf32>, vector<16x256xf32> -> vector<16x256xf32>
    %30 = arith.addf %25, %29 : vector<16x256xf32>
    %31 = vector.extract_strided_slice %14 {offsets = [48, 0], sizes = [16, 64], strides = [1, 1]} : vector<144x64xf32> to vector<16x64xf32>
    %c3 = arith.constant 3 : index
    %c0_21 = arith.constant 0 : index
    %c0_22 = arith.constant 0 : index
    %32 = vector.load %arg4[%c3, %c0_21, %c0_22] : memref<9x64x256xf32, #tpu.memory_space<vmem>>, vector<1x64x256xf32>
    %33 = vector.shape_cast %32 : vector<1x64x256xf32> to vector<64x256xf32>
    %cst_23 = arith.constant dense<0.000000e+00> : vector<16x256xf32>
    %34 = tpu.matmul %31, %33, %cst_23 {dimension_numbers = #tpu.dot_dimension_numbers<[1], [0], [0], [1], [0, 0, 1, 1], [], []>} : vector<16x64xf32>, vector<64x256xf32>, vector<16x256xf32> -> vector<16x256xf32>
    %35 = arith.addf %30, %34 : vector<16x256xf32>
    %36 = vector.extract_strided_slice %14 {offsets = [64, 0], sizes = [16, 64], strides = [1, 1]} : vector<144x64xf32> to vector<16x64xf32>
    %c4 = arith.constant 4 : index
    %c0_24 = arith.constant 0 : index
    %c0_25 = arith.constant 0 : index
    %37 = vector.load %arg4[%c4, %c0_24, %c0_25] : memref<9x64x256xf32, #tpu.memory_space<vmem>>, vector<1x64x256xf32>
    %38 = vector.shape_cast %37 : vector<1x64x256xf32> to vector<64x256xf32>
    %cst_26 = arith.constant dense<0.000000e+00> : vector<16x256xf32>
    %39 = tpu.matmul %36, %38, %cst_26 {dimension_numbers = #tpu.dot_dimension_numbers<[1], [0], [0], [1], [0, 0, 1, 1], [], []>} : vector<16x64xf32>, vector<64x256xf32>, vector<16x256xf32> -> vector<16x256xf32>
    %40 = arith.addf %35, %39 : vector<16x256xf32>
    %41 = vector.extract_strided_slice %14 {offsets = [80, 0], sizes = [16, 64], strides = [1, 1]} : vector<144x64xf32> to vector<16x64xf32>
    %c5 = arith.constant 5 : index
    %c0_27 = arith.constant 0 : index
    %c0_28 = arith.constant 0 : index
    %42 = vector.load %arg4[%c5, %c0_27, %c0_28] : memref<9x64x256xf32, #tpu.memory_space<vmem>>, vector<1x64x256xf32>
    %43 = vector.shape_cast %42 : vector<1x64x256xf32> to vector<64x256xf32>
    %cst_29 = arith.constant dense<0.000000e+00> : vector<16x256xf32>
    %44 = tpu.matmul %41, %43, %cst_29 {dimension_numbers = #tpu.dot_dimension_numbers<[1], [0], [0], [1], [0, 0, 1, 1], [], []>} : vector<16x64xf32>, vector<64x256xf32>, vector<16x256xf32> -> vector<16x256xf32>
    %45 = arith.addf %40, %44 : vector<16x256xf32>
    %46 = vector.extract_strided_slice %14 {offsets = [96, 0], sizes = [16, 64], strides = [1, 1]} : vector<144x64xf32> to vector<16x64xf32>
    %c6 = arith.constant 6 : index
    %c0_30 = arith.constant 0 : index
    %c0_31 = arith.constant 0 : index
    %47 = vector.load %arg4[%c6, %c0_30, %c0_31] : memref<9x64x256xf32, #tpu.memory_space<vmem>>, vector<1x64x256xf32>
    %48 = vector.shape_cast %47 : vector<1x64x256xf32> to vector<64x256xf32>
    %cst_32 = arith.constant dense<0.000000e+00> : vector<16x256xf32>
    %49 = tpu.matmul %46, %48, %cst_32 {dimension_numbers = #tpu.dot_dimension_numbers<[1], [0], [0], [1], [0, 0, 1, 1], [], []>} : vector<16x64xf32>, vector<64x256xf32>, vector<16x256xf32> -> vector<16x256xf32>
    %50 = arith.addf %45, %49 : vector<16x256xf32>
    %51 = vector.extract_strided_slice %14 {offsets = [112, 0], sizes = [16, 64], strides = [1, 1]} : vector<144x64xf32> to vector<16x64xf32>
    %c7 = arith.constant 7 : index
    %c0_33 = arith.constant 0 : index
    %c0_34 = arith.constant 0 : index
    %52 = vector.load %arg4[%c7, %c0_33, %c0_34] : memref<9x64x256xf32, #tpu.memory_space<vmem>>, vector<1x64x256xf32>
    %53 = vector.shape_cast %52 : vector<1x64x256xf32> to vector<64x256xf32>
    %cst_35 = arith.constant dense<0.000000e+00> : vector<16x256xf32>
    %54 = tpu.matmul %51, %53, %cst_35 {dimension_numbers = #tpu.dot_dimension_numbers<[1], [0], [0], [1], [0, 0, 1, 1], [], []>} : vector<16x64xf32>, vector<64x256xf32>, vector<16x256xf32> -> vector<16x256xf32>
    %55 = arith.addf %50, %54 : vector<16x256xf32>
    %56 = vector.extract_strided_slice %14 {offsets = [128, 0], sizes = [16, 64], strides = [1, 1]} : vector<144x64xf32> to vector<16x64xf32>
    %c8 = arith.constant 8 : index
    %c0_36 = arith.constant 0 : index
    %c0_37 = arith.constant 0 : index
    %57 = vector.load %arg4[%c8, %c0_36, %c0_37] : memref<9x64x256xf32, #tpu.memory_space<vmem>>, vector<1x64x256xf32>
    %58 = vector.shape_cast %57 : vector<1x64x256xf32> to vector<64x256xf32>
    %cst_38 = arith.constant dense<0.000000e+00> : vector<16x256xf32>
    %59 = tpu.matmul %56, %58, %cst_38 {dimension_numbers = #tpu.dot_dimension_numbers<[1], [0], [0], [1], [0, 0, 1, 1], [], []>} : vector<16x64xf32>, vector<64x256xf32>, vector<16x256xf32> -> vector<16x256xf32>
    %60 = arith.addf %55, %59 : vector<16x256xf32>
    %c0_39 = arith.constant 0 : index
    %c0_40 = arith.constant 0 : index
    %61 = vector.load %arg5[%c0_39, %c0_40] : memref<1x256xf32, #tpu.memory_space<vmem>>, vector<1x256xf32>
    %62 = vector.broadcast %61 : vector<1x256xf32> to vector<16x256xf32>
    %63 = arith.addf %60, %62 : vector<16x256xf32>
    %64 = vector.extract_strided_slice %63 {offsets = [0, 0], sizes = [16, 128], strides = [1, 1]} : vector<16x256xf32> to vector<16x128xf32>
    %cst_41 = arith.constant 0.000000e+00 : f32
    %65 = vector.broadcast %cst_41 : f32 to vector<16x128xf32>
    %66 = arith.maximumf %64, %65 : vector<16x128xf32>
    %67 = vector.extract_strided_slice %63 {offsets = [0, 128], sizes = [16, 128], strides = [1, 1]} : vector<16x256xf32> to vector<16x128xf32>
    %68 = arith.addf %66, %67 : vector<16x128xf32>
    %cst_42 = arith.constant 0.000000e+00 : f32
    %69 = vector.broadcast %cst_42 : f32 to vector<16x128xf32>
    %70 = arith.maximumf %68, %69 : vector<16x128xf32>
    %cst_43 = arith.constant 6.250000e-02 : f32
    %71 = vector.broadcast %cst_43 : f32 to vector<1x16xf32>
    %cst_44 = arith.constant dense<0.000000e+00> : vector<1x128xf32>
    %72 = tpu.matmul %71, %70, %cst_44 {dimension_numbers = #tpu.dot_dimension_numbers<[1], [0], [0], [1], [0, 0, 1, 1], [], []>} : vector<1x16xf32>, vector<16x128xf32>, vector<1x128xf32> -> vector<1x128xf32>
    %c0_45 = arith.constant 0 : index
    %c0_46 = arith.constant 0 : index
    %73 = vector.load %arg6[%c0_45, %c0_46] : memref<128x64xf32, #tpu.memory_space<vmem>>, vector<128x64xf32>
    %cst_47 = arith.constant dense<0.000000e+00> : vector<1x64xf32>
    %74 = tpu.matmul %72, %73, %cst_47 {dimension_numbers = #tpu.dot_dimension_numbers<[1], [0], [0], [1], [0, 0, 1, 1], [], []>} : vector<1x128xf32>, vector<128x64xf32>, vector<1x64xf32> -> vector<1x64xf32>
    %c0_48 = arith.constant 0 : index
    %c0_49 = arith.constant 0 : index
    %75 = vector.load %arg7[%c0_48, %c0_49] : memref<1x64xf32, #tpu.memory_space<vmem>>, vector<1x64xf32>
    %76 = arith.addf %74, %75 : vector<1x64xf32>
    %cst_50 = arith.constant 0.000000e+00 : f32
    %77 = vector.broadcast %cst_50 : f32 to vector<1x64xf32>
    %78 = arith.maximumf %76, %77 : vector<1x64xf32>
    %c0_51 = arith.constant 0 : index
    %c0_52 = arith.constant 0 : index
    %79 = vector.load %arg8[%c0_51, %c0_52] : memref<64x1xf32, #tpu.memory_space<vmem>>, vector<64x1xf32>
    %cst_53 = arith.constant dense<0.000000e+00> : vector<1x1xf32>
    %80 = tpu.matmul %78, %79, %cst_53 {dimension_numbers = #tpu.dot_dimension_numbers<[1], [0], [0], [1], [0, 0, 1, 1], [], []>} : vector<1x64xf32>, vector<64x1xf32>, vector<1x1xf32> -> vector<1x1xf32>
    %c0_54 = arith.constant 0 : index
    %c0_55 = arith.constant 0 : index
    %81 = vector.load %arg9[%c0_54, %c0_55] : memref<1x1xf32, #tpu.memory_space<vmem>>, vector<1x1xf32>
    %82 = arith.addf %80, %81 : vector<1x1xf32>
    %83 = math.sin %82 : vector<1x1xf32>
    %cst_56 = arith.constant 1.000000e+00 : f32
    %84 = vector.broadcast %cst_56 : f32 to vector<1x1xf32>
    %85 = arith.addf %84, %83 : vector<1x1xf32>
    %cst_57 = arith.constant 5.000000e-01 : f32
    %86 = vector.broadcast %cst_57 : f32 to vector<1x1xf32>
    %87 = arith.mulf %86, %85 : vector<1x1xf32>
    %c0_58 = arith.constant 0 : index
    %c0_59 = arith.constant 0 : index
    %88 = vector.load %arg10[%c0_58, %c0_59] : memref<1x1xf32, #tpu.memory_space<vmem>>, vector<1x1xf32>
    tpu.vector_store %arg10[%c0_58, %c0_59], %87 {strides = array<i32>} : memref<1x1xf32, #tpu.memory_space<vmem>>, vector<1x1xf32>,
    return
  }
}

</mosaic_0001>

<bundles_post_ra>
// kernel: forward.1
= control target key start
LH: loop header
LB: loop body
LE: loop exit
PB: predicated region body
PF: predicated region fallthrough
CT: control target
= control target key end

     0   :  { %s2286_s0 = inlined_call_operand.vmem [shape: f32[64,32], index: 0, kind: input, shape index: {}]   ;;  %s2287_s1 = inlined_call_operand.vmem [shape: f32[32,128], index: 1, kind: input, shape index: {}]   ;;  %s2288_s2 = inlined_call_operand.vmem [shape: f32[1,128], index: 2, kind: input, shape index: {}]   ;;  %s2289_s3 = inlined_call_operand.vmem [shape: f32[144,64], index: 3, kind: input, shape index: {}]   ;;  %s2290_s4 = inlined_call_operand.vmem [shape: f32[9,64,256], index: 4, kind: input, shape index: {}]   ;;  %s2291_s5 = inlined_call_operand.vmem [shape: f32[1,256], index: 5, kind: input, shape index: {}]   ;;  %s2292_s6 = inlined_call_operand.vmem [shape: f32[128,64], index: 6, kind: input, shape index: {}]   ;;  %s2293_s7 = inlined_call_operand.vmem [shape: f32[1,64], index: 7, kind: input, shape index: {}]   ;;  %s2294_s8 = inlined_call_operand.vmem [shape: f32[64,1], index: 8, kind: input, shape index: {}]   ;;  %s2295_s9 = inlined_call_operand.<no memory space> [shape: f32[1,1], index: 9, kind: input, shape index: {}]   ;;  %s2296_s10 = inlined_call_operand.hbm [shape: f32[1,1], index: 10, kind: output, shape index: {}]  }
   0x1   :  { %v15_v0 = vstv %s2295_s9 }
   0x2   :  { %16 = vst [vmem:[#allocation2] sm:$0x1] %v15_v0 }
   0x3   :  { %v49_v1 = vld [vmem:[%s2287_s1 + $0x18] sm:$0xff]  ;;  %v48_v2 = vld [vmem:[%s2287_s1 + $0x10] sm:$0xff]  ;;  %v47_v3 = vld [vmem:[%s2287_s1 + $0x8] sm:$0xff] }
   0x4   :  { %91 = vmatpush.msra.mxu0 %v49_v1 }
   0x6   :  { %92 = vmatpush.msra.mxu0 %v48_v2 }
   0x7   :  { %17 = vsyncpa [#allocation4], 0  ;;  %v46_v4 = vld [vmem:[%s2287_s1] sm:$0xff]  ;;  %vm54_vm0 = vcmask 261120   ;;  %v39_v6 = vld [vmem:[%s2286_s0 + $0x8] sm:$0xff]  ;;  %s1485_s19 = smov 64  }
   0x8   :  { %93 = vmatpush.msra.mxu0 %v47_v3  ;;  %v38_v5 = vld [vmem:[%s2286_s0] sm:$0xff]  ;;  %v40_v7 = vld [vmem:[%s2286_s0 + $0x10] sm:$0xff]  ;;  %v41_v8 = vld [vmem:[%s2286_s0 + $0x18] sm:$0xff]  ;;  %vm194_vm1 = vcmask 523264   ;;  %vm984_vm2 = vcmask 130048   ;;  %s1244_s20 = sshll.u32 %s2296_s10, 4  ;;  %s1245_s20 = int_to_ptr.hbm [resolvable:$true] %s1244_s20 }
   0x9   :  { %v42_v9 = vld [vmem:[%s2286_s0 + $0x20] sm:$0xff]  ;;  %v43_v10 = vld [vmem:[%s2286_s0 + $0x28] sm:$0xff]  ;;  %v44_v11 = vld [vmem:[%s2286_s0 + $0x30] sm:$0xff] }
   0xa   :  { %94 = vmatpush.msra.mxu0 %v46_v4  ;;  %v45_v12 = vld [vmem:[%s2286_s0 + $0x38] sm:$0xff]  ;;  %v1458_v16 = vld [vmem:[%s2288_s2] ss:$0 sm:$0xff]  ;;  %v177_v63 = vld [vmem:[%s2289_s3 + $0x8] sm:$0xff] }
   0xb   :  { %1253 = vmatmul.msk.f32.vlgmr.msra.gmra.mxu0 %vm54_vm0, %v38_v5  ;;  %v176_v62 = vld [vmem:[%s2289_s3] sm:$0xff]  ;;  %v178_v0 = vld [vmem:[%s2289_s3 + $0x10] sm:$0xff]  ;;  %v179_v1 = vld [vmem:[%s2289_s3 + $0x18] sm:$0xff] }
   0xc   :  { %v180_v2 = vld [vmem:[%s2289_s3 + $0x20] sm:$0xff]  ;;  %v181_v3 = vld [vmem:[%s2289_s3 + $0x28] sm:$0xff]  ;;  %v182_v4 = vld [vmem:[%s2289_s3 + $0x30] sm:$0xff] }
   0xd   :  { %v183_v5 = vld [vmem:[%s2289_s3 + $0x38] sm:$0xff] }
  0x13   :  { %1254 = vmatmul.msk.f32.gmra.mxu0 %vm54_vm0, %v39_v6  ;;  %v184_v6 = vld [vmem:[%s2289_s3 + $0x40] sm:$0xff] }
  0x1b   :  { %1255 = vmatmul.msk.f32.gmra.mxu0 %vm54_vm0, %v40_v7  ;;  %v185_v7 = vld [vmem:[%s2289_s3 + $0x48] sm:$0xff] }
  0x23   :  { %1256 = vmatmul.msk.f32.gmra.mxu0 %vm54_vm0, %v41_v8  ;;  %v186_v8 = vld [vmem:[%s2289_s3 + $0x50] sm:$0xff] }
  0x2b   :  { %1257 = vmatmul.msk.f32.gmra.mxu0 %vm54_vm0, %v42_v9  ;;  %v187_v9 = vld [vmem:[%s2289_s3 + $0x58] sm:$0xff] }
  0x33   :  { %1258 = vmatmul.msk.f32.gmra.mxu0 %vm54_vm0, %v43_v10  ;;  %v188_v10 = vld [vmem:[%s2289_s3 + $0x60] sm:$0xff] }
  0x3b   :  { %1259 = vmatmul.msk.f32.gmra.mxu0 %vm54_vm0, %v44_v11  ;;  %v1293_v11 = vld [vmem:[%s2290_s4 + $0xf0] sm:$0xff] }
  0x3c   :  { %367 = vmatpush.msra.mxu2 %v1293_v11  ;;  %v1338_v11 = vld [vmem:[%s2290_s4 + $0x1f8] sm:$0xff] }
  0x43   :  { %1260 = vmatmul.msk.f32.gmra.mxu0 %vm54_vm0, %v45_v12  ;;  %v1294_v12 = vld [vmem:[%s2290_s4 + $0xf8] sm:$0xff] }
  0x44   :  { %390 = vmatpush.msra.mxu3 %v1294_v12 }
  0x88   :  { %v96_v13 = vpop.f32.mrf.mxu0 }
  0x89   :  { %v97_v26 = vadd.f32 %v1458_v16, %v96_v13  ;;  %v1291_v13 = vld [vmem:[%s2290_s4 + $0xe0] sm:$0xff] }
  0x8a   :  { %368 = vmatpush.msra.mxu2 %v1291_v13  ;;  %v1345_v13 = vld [vmem:[%s2290_s4 + $0x210] sm:$0xff] }
  0x8b   :  { %v120_v56 = vmax.f32 %v97_v26, 0.0 }
  0x90   :  { %v99_v14 = vpop.f32.mrf.mxu0 }
  0x91   :  { %v100_v29 = vadd.f32 %v1458_v16, %v99_v14  ;;  %v1292_v14 = vld [vmem:[%s2290_s4 + $0xe8] sm:$0xff] }
  0x92   :  { %391 = vmatpush.msra.mxu3 %v1292_v14  ;;  %v1335_v14 = vld [vmem:[%s2290_s4 + $0x1e0] sm:$0xff] }
  0x93   :  { %v121_v52 = vmax.f32 %v100_v29, 0.0 }
  0x98   :  { %v102_v15 = vpop.f32.mrf.mxu0 }
  0x99   :  { %v103_v20 = vadd.f32 %v1458_v16, %v102_v15  ;;  %v1289_v15 = vld [vmem:[%s2290_s4 + $0xd0] sm:$0xff] }
  0x9a   :  { %369 = vmatpush.msra.mxu2 %v1289_v15  ;;  %v1336_v15 = vld [vmem:[%s2290_s4 + $0x1e8] sm:$0xff] }
  0x9b   :  { %v122_v48 = vmax.f32 %v103_v20, 0.0 }
  0xa0   :  { %v105_v17 = vpop.f32.mrf.mxu0 }
  0xa1   :  { %v106_v18 = vadd.f32 %v1458_v16, %v105_v17  ;;  %v1287_v17 = vld [vmem:[%s2290_s4 + $0xc0] sm:$0xff] }
  0xa2   :  { %370 = vmatpush.msra.mxu2 %v1287_v17  ;;  %v1333_v17 = vld [vmem:[%s2290_s4 + $0x1d0] sm:$0xff] }
  0xa3   :  { %142 = vrot.lane.b32.xlu2 %v106_v18, %s1485_s19  ;;  %v123_v43 = vmax.f32 %v106_v18, 0.0  ;;  %v1288_v18 = vld [vmem:[%s2290_s4 + $0xc8] sm:$0xff] }
  0xa8   :  { %v108_v19 = vpop.f32.mrf.mxu0 }
  0xa9   :  { %v109_v24 = vadd.f32 %v1458_v16, %v108_v19  ;;  %v189_v19 = vld [vmem:[%s2289_s3 + $0x68] sm:$0xff] }
  0xab   :  { %140 = vrot.lane.b32.xlu2 %v103_v20, %s1485_s19  ;;  %v124_v41 = vmax.f32 %v109_v24, 0.0  ;;  %v1285_v20 = vld [vmem:[%s2290_s4 + $0xb0] sm:$0xff] }
  0xac   :  { %371 = vmatpush.msra.mxu2 %v1285_v20  ;;  %v1331_v20 = vld [vmem:[%s2290_s4 + $0x1c0] sm:$0xff] }
  0xb0   :  { %v111_v21 = vpop.f32.mrf.mxu0 }
  0xb1   :  { %v112_v22 = vadd.f32 %v1458_v16, %v111_v21  ;;  %v1286_v21 = vld [vmem:[%s2290_s4 + $0xb8] sm:$0xff] }
  0xb3   :  { %146 = vrot.lane.b32.xlu1 %v112_v22, %s1485_s19  ;;  %v125_v37 = vmax.f32 %v112_v22, 0.0  ;;  %v1283_v22 = vld [vmem:[%s2290_s4 + $0xa0] sm:$0xff] }
  0xb4   :  { %372 = vmatpush.msra.mxu2 %v1283_v22  ;;  %v1329_v22 = vld [vmem:[%s2290_s4 + $0x1b0] sm:$0xff] }
  0xb8   :  { %v114_v23 = vpop.f32.mrf.mxu0 }
  0xb9   :  { %v115_v28 = vadd.f32 %v1458_v16, %v114_v23  ;;  %v1284_v23 = vld [vmem:[%s2290_s4 + $0xa8] sm:$0xff] }
  0xbb   :  { %144 = vrot.lane.b32.xlu1 %v109_v24, %s1485_s19  ;;  %v126_v38 = vmax.f32 %v115_v28, 0.0  ;;  %v1281_v24 = vld [vmem:[%s2290_s4 + $0x90] sm:$0xff] }
  0xbc   :  { %373 = vmatpush.msra.mxu2 %v1281_v24 }
  0xc0   :  { %v117_v25 = vpop.f32.mrf.mxu0 }
  0xc1   :  { %v118_v27 = vadd.f32 %v1458_v16, %v117_v25  ;;  %v1290_v16 = vld [vmem:[%s2290_s4 + $0xd8] sm:$0xff] }
  0xc2   :  { %392 = vmatpush.msra.mxu3 %v1290_v16  ;;  %v1282_v25 = vld [vmem:[%s2290_s4 + $0x98] sm:$0xff]  ;;  %v1343_v16 = vld [vmem:[%s2290_s4 + $0x200] sm:$0xff] }
  0xc3   :  { %150 = vrot.lane.b32.xlu0 %v118_v27, %s1485_s19  ;;  %136 = vrot.lane.b32.xlu1 %v97_v26, %s1485_s19  ;;  %v127_v31 = vmax.f32 %v118_v27, 0.0  ;;  %v1279_v26 = vld [vmem:[%s2290_s4 + $0x80] sm:$0xff]  ;;  %v1280_v27 = vld [vmem:[%s2290_s4 + $0x88] sm:$0xff] }
  0xc4   :  { %393 = vmatpush.msra.mxu3 %v1288_v18  ;;  %374 = vmatpush.msra.mxu2 %v1279_v26  ;;  %v1334_v18 = vld [vmem:[%s2290_s4 + $0x1d8] sm:$0xff]  ;;  %v1327_v26 = vld [vmem:[%s2290_s4 + $0x1a0] sm:$0xff] }
  0xc6   :  { %394 = vmatpush.msra.mxu3 %v1286_v21  ;;  %v1332_v21 = vld [vmem:[%s2290_s4 + $0x1c8] sm:$0xff] }
  0xc8   :  { %395 = vmatpush.msra.mxu3 %v1284_v23  ;;  %v1330_v23 = vld [vmem:[%s2290_s4 + $0x1b8] sm:$0xff] }
  0xca   :  { %396 = vmatpush.msra.mxu3 %v1282_v25  ;;  %v1376_v25 = vld [vmem:[%s2290_s4 + $0x2e8] sm:$0xff] }
  0xcb   :  { %148 = vrot.lane.b32.xlu0 %v115_v28, %s1485_s19  ;;  %v190_v28 = vld [vmem:[%s2289_s3 + $0x70] sm:$0xff] }
  0xcc   :  { %397 = vmatpush.msra.mxu3 %v1280_v27  ;;  %v1328_v27 = vld [vmem:[%s2290_s4 + $0x1a8] sm:$0xff] }
  0xd3   :  { %138 = vrot.lane.b32.xlu0 %v100_v29, %s1485_s19  ;;  %v334_v29 = vld [vmem:[%s2290_s4 + $0x70] sm:$0xff] }
  0xd4   :  { %419 = vmatpush.msrb.mxu2 %v334_v29  ;;  %v1325_v29 = vld [vmem:[%s2290_s4 + $0x190] sm:$0xff] }
  0xfd   :  { %v143_v34 = vpop.permute.xlu2 %142 }
  0xfe   :  { %v163_v47 = vadd.f32 %v143_v34, %v123_v43  ;;  %v331_v34 = vld [vmem:[%s2290_s4 + $0x58] sm:$0xff] }
  0xff   :  { %v323_v43 = vld [vmem:[%s2290_s4 + $0x18] sm:$0xff] }
 0x100   :  { %v171_v55 = vmax.f32 %v163_v47, 0.0  ;;  %v192_v47 = vld [vmem:[%s2289_s3 + $0x80] sm:$0xff] }
 0x105   :  { %v141_v46 = vpop.permute.xlu2 %140 }
 0x106   :  { %v162_v50 = vadd.f32 %v141_v46, %v122_v48  ;;  %v1357_v48 = vld [vmem:[%s2290_s4 + $0x270] sm:$0xff] }
 0x107   :  { %634 = vmatpush.msrb.mxu0 %v1357_v48 }
 0x108   :  { %v170_v58 = vmax.f32 %v162_v50, 0.0  ;;  %v193_v50 = vld [vmem:[%s2289_s3 + $0x88] sm:$0xff] }
 0x125   :  { %v147_v30 = vpop.permute.xlu1 %146 }
 0x126   :  { %v165_v40 = vadd.f32 %v147_v30, %v125_v37  ;;  %v335_v30 = vld [vmem:[%s2290_s4 + $0x78] sm:$0xff] }
 0x127   :  { %442 = vmatpush.msrb.mxu3 %v335_v30  ;;  %v191_v37 = vld [vmem:[%s2289_s3 + $0x78] sm:$0xff] }
 0x128   :  { %v173_v49 = vmax.f32 %v165_v40, 0.0  ;;  %v324_v40 = vld [vmem:[%s2290_s4 + $0x20] sm:$0xff]  ;;  %v1326_v30 = vld [vmem:[%s2290_s4 + $0x198] sm:$0xff] }
 0x12d   :  { %v145_v36 = vpop.permute.xlu1 %144 }
 0x12e   :  { %v164_v44 = vadd.f32 %v145_v36, %v124_v41  ;;  %v329_v36 = vld [vmem:[%s2290_s4 + $0x48] sm:$0xff] }
 0x12f   :  { %v325_v41 = vld [vmem:[%s2290_s4 + $0x28] sm:$0xff] }
 0x130   :  { %v172_v51 = vmax.f32 %v164_v44, 0.0  ;;  %v320_v44 = vld [vmem:[%s2290_s4] sm:$0xff] }
 0x135   :  { %v151_v32 = vpop.permute.xlu0 %150  ;;  %v137_v53 = vpop.permute.xlu1 %136 }
 0x136   :  { %v167_v33 = vadd.f32 %v151_v32, %v127_v31  ;;  %v160_v59 = vadd.f32 %v137_v53, %v120_v56  ;;  %v332_v31 = vld [vmem:[%s2290_s4 + $0x60] sm:$0xff]  ;;  %v333_v32 = vld [vmem:[%s2290_s4 + $0x68] sm:$0xff]  ;;  %v1318_v53 = vld [vmem:[%s2290_s4 + $0x178] sm:$0xff] }
 0x137   :  { %420 = vmatpush.msrb.mxu2 %v332_v31  ;;  %443 = vmatpush.msrb.mxu3 %v333_v32  ;;  %v1316_v56 = vld [vmem:[%s2290_s4 + $0x168] sm:$0xff]  ;;  %v1323_v32 = vld [vmem:[%s2290_s4 + $0x180] sm:$0xff] }
 0x138   :  { %v175_v35 = vmax.f32 %v167_v33, 0.0  ;;  %v168_v61 = vmax.f32 %v160_v59, 0.0  ;;  %v330_v33 = vld [vmem:[%s2290_s4 + $0x50] sm:$0xff]  ;;  %v1372_v31 = vld [vmem:[%s2290_s4 + $0x2c8] sm:$0xff] }
 0x139   :  { %421 = vmatpush.msrb.mxu2 %v330_v33  ;;  %444 = vmatpush.msrb.mxu3 %v331_v34  ;;  %v1353_v59 = vld [vmem:[%s2290_s4 + $0x250] sm:$0xff]  ;;  %v1324_v33 = vld [vmem:[%s2290_s4 + $0x188] sm:$0xff]  ;;  %v1358_v34 = vld [vmem:[%s2290_s4 + $0x278] sm:$0xff] }
 0x13a   :  { %257 = vmatpush.msra.mxu1 %v175_v35  ;;  %v328_v35 = vld [vmem:[%s2290_s4 + $0x40] sm:$0xff] }
 0x13b   :  { %422 = vmatpush.msrb.mxu2 %v328_v35  ;;  %445 = vmatpush.msrb.mxu3 %v329_v36  ;;  %v1377_v35 = vld [vmem:[%s2290_s4 + $0x2f0] sm:$0xff] }
 0x13d   :  { %v149_v39 = vpop.permute.xlu0 %148 }
 0x13e   :  { %v166_v42 = vadd.f32 %v149_v39, %v126_v38  ;;  %v326_v38 = vld [vmem:[%s2290_s4 + $0x30] sm:$0xff]  ;;  %v327_v39 = vld [vmem:[%s2290_s4 + $0x38] sm:$0xff] }
 0x13f   :  { %423 = vmatpush.msrb.mxu2 %v326_v38  ;;  %446 = vmatpush.msrb.mxu3 %v327_v39  ;;  %v1356_v38 = vld [vmem:[%s2290_s4 + $0x268] sm:$0xff]  ;;  %v1375_v39 = vld [vmem:[%s2290_s4 + $0x2e0] sm:$0xff] }
 0x140   :  { %v174_v45 = vmax.f32 %v166_v42, 0.0  ;;  %v322_v42 = vld [vmem:[%s2290_s4 + $0x10] sm:$0xff] }
 0x141   :  { %424 = vmatpush.msrb.mxu2 %v324_v40  ;;  %447 = vmatpush.msrb.mxu3 %v325_v41  ;;  %v1368_v40 = vld [vmem:[%s2290_s4 + $0x2a8] sm:$0xff]  ;;  %v1354_v41 = vld [vmem:[%s2290_s4 + $0x258] sm:$0xff] }
 0x142   :  { %258 = vmatpush.msra.mxu1 %v174_v45  ;;  %v321_v45 = vld [vmem:[%s2290_s4 + $0x8] sm:$0xff] }
 0x143   :  { %425 = vmatpush.msrb.mxu2 %v322_v42  ;;  %448 = vmatpush.msrb.mxu3 %v323_v43  ;;  %v1373_v42 = vld [vmem:[%s2290_s4 + $0x2d0] sm:$0xff]  ;;  %v1366_v43 = vld [vmem:[%s2290_s4 + $0x298] sm:$0xff] }
 0x144   :  { %259 = vmatpush.msra.mxu1 %v173_v49 }
 0x145   :  { %v139_v54 = vpop.permute.xlu0 %138  ;;  %426 = vmatpush.msrb.mxu2 %v320_v44  ;;  %449 = vmatpush.msrb.mxu3 %v321_v45  ;;  %v1352_v44 = vld [vmem:[%s2290_s4 + $0x248] sm:$0xff]  ;;  %v1371_v45 = vld [vmem:[%s2290_s4 + $0x2c0] sm:$0xff] }
 0x146   :  { %v161_v57 = vadd.f32 %v139_v54, %v121_v52  ;;  %260 = vmatpush.msra.mxu1 %v172_v51  ;;  %v1355_v51 = vld [vmem:[%s2290_s4 + $0x260] sm:$0xff]  ;;  %v1317_v52 = vld [vmem:[%s2290_s4 + $0x170] sm:$0xff] }
 0x147   :  { %635 = vmatpush.msrb.mxu0 %v1355_v51  ;;  %v1367_v51 = vld [vmem:[%s2290_s4 + $0x2a0] sm:$0xff] }
 0x148   :  { %261 = vmatpush.msra.mxu1 %v171_v55  ;;  %v169_v60 = vmax.f32 %v161_v57, 0.0  ;;  %v1315_v55 = vld [vmem:[%s2290_s4 + $0x160] sm:$0xff]  ;;  %v1313_v57 = vld [vmem:[%s2290_s4 + $0x150] sm:$0xff] }
 0x149   :  { %636 = vmatpush.msrb.mxu0 %v1353_v59  ;;  %v1395_v59 = vld [vmem:[%s2290_s4 + $0x360] sm:$0xff] }
 0x14a   :  { %262 = vmatpush.msra.mxu1 %v170_v58  ;;  %v1314_v58 = vld [vmem:[%s2290_s4 + $0x158] sm:$0xff] }
 0x14c   :  { %263 = vmatpush.msra.mxu1 %v169_v60  ;;  %v1311_v60 = vld [vmem:[%s2290_s4 + $0x140] sm:$0xff] }
 0x14e   :  { %264 = vmatpush.msra.mxu1 %v168_v61  ;;  %v1312_v61 = vld [vmem:[%s2290_s4 + $0x148] sm:$0xff] }
 0x14f   :  { %1261 = vmatmul.msk.f32.vlgmr.msra.gmra.mxu1 %vm194_vm1, %v176_v62  ;;  %v1309_v62 = vld [vmem:[%s2290_s4 + $0x130] sm:$0xff] }
 0x157   :  { %1262 = vmatmul.msk.f32.gmra.mxu1 %vm194_vm1, %v177_v63  ;;  %v1310_v63 = vld [vmem:[%s2290_s4 + $0x138] sm:$0xff] }
 0x15f   :  { %1263 = vmatmul.msk.f32.gmra.mxu1 %vm194_vm1, %v178_v0 }
 0x167   :  { %1264 = vmatmul.msk.f32.gmra.mxu1 %vm194_vm1, %v179_v1  ;;  %v1351_v1 = vld [vmem:[%s2290_s4 + $0x240] sm:$0xff] }
 0x168   :  { %637 = vmatpush.msrb.mxu0 %v1351_v1  ;;  %v1413_v1 = vld [vmem:[%s2290_s4 + $0x3d0] sm:$0xff] }
 0x16f   :  { %1265 = vmatmul.msk.f32.gmra.mxu1 %vm194_vm1, %v180_v2  ;;  %v1307_v2 = vld [vmem:[%s2290_s4 + $0x120] sm:$0xff] }
 0x177   :  { %1266 = vmatmul.msk.f32.gmra.mxu1 %vm194_vm1, %v181_v3  ;;  %v1308_v3 = vld [vmem:[%s2290_s4 + $0x128] sm:$0xff] }
 0x17f   :  { %1267 = vmatmul.msk.f32.gmra.mxu1 %vm194_vm1, %v182_v4  ;;  %v1349_v4 = vld [vmem:[%s2290_s4 + $0x230] sm:$0xff] }
 0x180   :  { %638 = vmatpush.msrb.mxu0 %v1349_v4 }
 0x187   :  { %1268 = vmatmul.msk.f32.gmra.mxu1 %vm194_vm1, %v183_v5  ;;  %v1305_v5 = vld [vmem:[%s2290_s4 + $0x110] sm:$0xff] }
 0x18f   :  { %1269 = vmatmul.msk.f32.gmra.mxu1 %vm194_vm1, %v184_v6  ;;  %v1306_v6 = vld [vmem:[%s2290_s4 + $0x118] sm:$0xff] }
 0x197   :  { %1270 = vmatmul.msk.f32.gmra.mxu1 %vm194_vm1, %v185_v7  ;;  %v1347_v7 = vld [vmem:[%s2290_s4 + $0x220] sm:$0xff] }
 0x198   :  { %639 = vmatpush.msrb.mxu0 %v1347_v7  ;;  %v1390_v7 = vld [vmem:[%s2290_s4 + $0x338] sm:$0xff] }
 0x19a   :  { %640 = vmatpush.msrb.mxu0 %v1345_v13  ;;  %v1386_v13 = vld [vmem:[%s2290_s4 + $0x318] sm:$0xff] }
 0x19c   :  { %641 = vmatpush.msrb.mxu0 %v1343_v16  ;;  %v1384_v16 = vld [vmem:[%s2290_s4 + $0x308] sm:$0xff] }
 0x19f   :  { %1271 = vmatmul.msk.f32.gmra.mxu1 %vm194_vm1, %v186_v8  ;;  %v1303_v8 = vld [vmem:[%s2290_s4 + $0x100] sm:$0xff] }
 0x1a7   :  { %1272 = vmatmul.msk.f32.gmra.mxu1 %vm194_vm1, %v187_v9  ;;  %v1304_v9 = vld [vmem:[%s2290_s4 + $0x108] sm:$0xff] }
 0x1af   :  { %1273 = vmatmul.msk.f32.gmra.mxu1 %vm194_vm1, %v188_v10  ;;  %v1337_v10 = vld [vmem:[%s2290_s4 + $0x1f0] sm:$0xff] }
 0x1b7   :  { %1274 = vmatmul.msk.f32.gmra.mxu1 %vm194_vm1, %v189_v19  ;;  %v1378_v19 = vld [vmem:[%s2290_s4 + $0x2f8] sm:$0xff] }
 0x1b8   :  { %730 = vmatpush.msra.mxu0 %v1378_v19  ;;  %v1437_v19 = vld [vmem:[%s2290_s4 + $0x470] sm:$0xff] }
 0x1ba   :  { %731 = vmatpush.msra.mxu0 %v1376_v25  ;;  %v1433_v25 = vld [vmem:[%s2290_s4 + $0x450] sm:$0xff] }
 0x1bf   :  { %1275 = vmatmul.msk.f32.gmra.mxu1 %vm194_vm1, %v190_v28  ;;  %v1374_v28 = vld [vmem:[%s2290_s4 + $0x2d8] sm:$0xff] }
 0x1c0   :  { %732 = vmatpush.msra.mxu0 %v1374_v28  ;;  %v1436_v28 = vld [vmem:[%s2290_s4 + $0x468] sm:$0xff] }
 0x1c2   :  { %733 = vmatpush.msra.mxu0 %v1372_v31  ;;  %v1434_v31 = vld [vmem:[%s2290_s4 + $0x458] sm:$0xff] }
 0x1c7   :  { %1276 = vmatmul.msk.f32.gmra.mxu1 %vm194_vm1, %v191_v37  ;;  %v1370_v37 = vld [vmem:[%s2290_s4 + $0x2b8] sm:$0xff] }
 0x1c8   :  { %734 = vmatpush.msra.mxu0 %v1370_v37  ;;  %v1404_v37 = vld [vmem:[%s2290_s4 + $0x388] sm:$0xff] }
 0x1ca   :  { %735 = vmatpush.msra.mxu0 %v1368_v40  ;;  %v1425_v40 = vld [vmem:[%s2290_s4 + $0x410] sm:$0xff] }
 0x1cc   :  { %v1760_v46 = vpop.f32.mrf.mxu1  ;;  %736 = vmatpush.msra.mxu0 %v1366_v43  ;;  %v1426_v43 = vld [vmem:[%s2290_s4 + $0x418] sm:$0xff] }
 0x1cf   :  { %1277 = vmatmul.msk.f32.gmra.mxu1 %vm194_vm1, %v192_v47  ;;  %v1369_v47 = vld [vmem:[%s2290_s4 + $0x2b0] sm:$0xff] }
 0x1d4   :  { %v1769_v49 = vpop.f32.mrf.mxu1 }
 0x1d7   :  { %1278 = vmatmul.msk.f32.gmra.mxu1 %vm194_vm1, %v193_v50  ;;  %v1348_v50 = vld [vmem:[%s2290_s4 + $0x228] sm:$0xff] }
 0x1dc   :  { %v272_v54 = vpop.f32.mrf.mxu1 }
 0x1dd   :  { %1295 = vmatmul.msk.f32.vlgmr.msra.gmra.mxu2 %vm194_vm1, %v272_v54  ;;  %1297 = vmatmul.msk.f32.vlgmr.msra.gmra.mxu3 %vm194_vm1, %v272_v54  ;;  %v1344_v54 = vld [vmem:[%s2290_s4 + $0x208] sm:$0xff] }
 0x1de   :  { %488 = vmatpush.msra.mxu2 %v1317_v52  ;;  %511 = vmatpush.msra.mxu3 %v1318_v53  ;;  %v1346_v52 = vld [vmem:[%s2290_s4 + $0x218] sm:$0xff]  ;;  %v1365_v53 = vld [vmem:[%s2290_s4 + $0x290] sm:$0xff] }
 0x1e0   :  { %489 = vmatpush.msra.mxu2 %v1315_v55  ;;  %512 = vmatpush.msra.mxu3 %v1316_v56  ;;  %v1363_v55 = vld [vmem:[%s2290_s4 + $0x280] sm:$0xff]  ;;  %v1397_v56 = vld [vmem:[%s2290_s4 + $0x370] sm:$0xff] }
 0x1e2   :  { %490 = vmatpush.msra.mxu2 %v1313_v57  ;;  %513 = vmatpush.msra.mxu3 %v1314_v58  ;;  %v1398_v58 = vld [vmem:[%s2290_s4 + $0x378] sm:$0xff] }
 0x1e4   :  { %v275_v0 = vpop.f32.mrf.mxu1  ;;  %491 = vmatpush.msra.mxu2 %v1311_v60  ;;  %514 = vmatpush.msra.mxu3 %v1312_v61  ;;  %v1417_v60 = vld [vmem:[%s2290_s4 + $0x3f0] sm:$0xff]  ;;  %v1396_v61 = vld [vmem:[%s2290_s4 + $0x368] sm:$0xff] }
 0x1e5   :  { %1296 = vmatmul.msk.f32.gmra.mxu2 %vm194_vm1, %v275_v0  ;;  %1298 = vmatmul.msk.f32.gmra.mxu3 %vm194_vm1, %v275_v0  ;;  %v1394_v0 = vld [vmem:[%s2290_s4 + $0x358] sm:$0xff] }
 0x1e6   :  { %492 = vmatpush.msra.mxu2 %v1309_v62  ;;  %515 = vmatpush.msra.mxu3 %v1310_v63  ;;  %v1415_v62 = vld [vmem:[%s2290_s4 + $0x3e0] sm:$0xff]  ;;  %v1393_v63 = vld [vmem:[%s2290_s4 + $0x350] sm:$0xff] }
 0x1e8   :  { %493 = vmatpush.msra.mxu2 %v1307_v2  ;;  %516 = vmatpush.msra.mxu3 %v1308_v3  ;;  %v1391_v2 = vld [vmem:[%s2290_s4 + $0x340] sm:$0xff]  ;;  %v1392_v3 = vld [vmem:[%s2290_s4 + $0x348] sm:$0xff] }
 0x1ea   :  { %494 = vmatpush.msra.mxu2 %v1305_v5  ;;  %517 = vmatpush.msra.mxu3 %v1306_v6  ;;  %v1389_v5 = vld [vmem:[%s2290_s4 + $0x330] sm:$0xff]  ;;  %v1411_v6 = vld [vmem:[%s2290_s4 + $0x3c0] sm:$0xff] }
 0x1ec   :  { %v278_v12 = vpop.f32.mrf.mxu1  ;;  %495 = vmatpush.msra.mxu2 %v1303_v8  ;;  %518 = vmatpush.msra.mxu3 %v1304_v9  ;;  %v1387_v8 = vld [vmem:[%s2290_s4 + $0x320] sm:$0xff]  ;;  %v1409_v9 = vld [vmem:[%s2290_s4 + $0x3b0] sm:$0xff] }
 0x1ed   :  { %1299 = vmatmul.msk.f32.vlgmr.msrb.gmra.mxu2 %vm194_vm1, %v1760_v46  ;;  %1301 = vmatmul.msk.f32.vlgmr.msrb.gmra.mxu3 %vm194_vm1, %v1760_v46  ;;  %v1350_v46 = vld [vmem:[%s2290_s4 + $0x238] sm:$0xff] }
 0x1ee   :  { %561 = vmatpush.msrb.mxu2 %v1337_v10  ;;  %584 = vmatpush.msrb.mxu3 %v1338_v11  ;;  %v1388_v10 = vld [vmem:[%s2290_s4 + $0x328] sm:$0xff]  ;;  %v1385_v11 = vld [vmem:[%s2290_s4 + $0x310] sm:$0xff] }
 0x1f0   :  { %562 = vmatpush.msrb.mxu2 %v1335_v14  ;;  %585 = vmatpush.msrb.mxu3 %v1336_v15  ;;  %v1383_v14 = vld [vmem:[%s2290_s4 + $0x300] sm:$0xff] }
 0x1f2   :  { %563 = vmatpush.msrb.mxu2 %v1333_v17  ;;  %586 = vmatpush.msrb.mxu3 %v1334_v18  ;;  %v1418_v17 = vld [vmem:[%s2290_s4 + $0x3f8] sm:$0xff]  ;;  %v1405_v18 = vld [vmem:[%s2290_s4 + $0x390] sm:$0xff] }
 0x1f4   :  { %v281_v24 = vpop.f32.mrf.mxu1  ;;  %564 = vmatpush.msrb.mxu2 %v1331_v20  ;;  %587 = vmatpush.msrb.mxu3 %v1332_v21  ;;  %v1416_v20 = vld [vmem:[%s2290_s4 + $0x3e8] sm:$0xff]  ;;  %v1403_v21 = vld [vmem:[%s2290_s4 + $0x380] sm:$0xff] }
 0x1f5   :  { %1300 = vmatmul.msk.f32.gmra.mxu2 %vm194_vm1, %v1769_v49  ;;  %1302 = vmatmul.msk.f32.gmra.mxu3 %vm194_vm1, %v1769_v49  ;;  %v1364_v49 = vld [vmem:[%s2290_s4 + $0x288] sm:$0xff] }
 0x1f6   :  { %565 = vmatpush.msrb.mxu2 %v1329_v22  ;;  %588 = vmatpush.msrb.mxu3 %v1330_v23  ;;  %v1435_v22 = vld [vmem:[%s2290_s4 + $0x460] sm:$0xff]  ;;  %v1414_v23 = vld [vmem:[%s2290_s4 + $0x3d8] sm:$0xff] }
 0x1f7   :  { %737 = vmatpush.msra.mxu0 %v1364_v49 }
 0x1f8   :  { %566 = vmatpush.msrb.mxu2 %v1327_v26  ;;  %589 = vmatpush.msrb.mxu3 %v1328_v27  ;;  %v1412_v26 = vld [vmem:[%s2290_s4 + $0x3c8] sm:$0xff] }
 0x1fa   :  { %567 = vmatpush.msrb.mxu2 %v1325_v29  ;;  %590 = vmatpush.msrb.mxu3 %v1326_v30  ;;  %v1431_v29 = vld [vmem:[%s2290_s4 + $0x440] sm:$0xff]  ;;  %v1410_v30 = vld [vmem:[%s2290_s4 + $0x3b8] sm:$0xff] }
 0x1fc   :  { %v284_v36 = vpop.f32.mrf.mxu1  ;;  %568 = vmatpush.msrb.mxu2 %v1323_v32  ;;  %591 = vmatpush.msrb.mxu3 %v1324_v33  ;;  %v1429_v32 = vld [vmem:[%s2290_s4 + $0x430] sm:$0xff]  ;;  %v1408_v33 = vld [vmem:[%s2290_s4 + $0x3a8] sm:$0xff] }
 0x1fd   :  { %1319 = vmatmul.msk.f32.vlgmr.msra.gmra.mxu2 %vm194_vm1, %v278_v12  ;;  %1321 = vmatmul.msk.f32.vlgmr.msra.gmra.mxu3 %vm194_vm1, %v278_v12  ;;  %v1407_v12 = vld [vmem:[%s2290_s4 + $0x3a0] sm:$0xff] }
 0x1fe   :  { %657 = vmatpush.msra.mxu2 %v1358_v34  ;;  %707 = vmatpush.msra.mxu3 %v1377_v35  ;;  %v1432_v34 = vld [vmem:[%s2290_s4 + $0x448] sm:$0xff]  ;;  %v1427_v35 = vld [vmem:[%s2290_s4 + $0x420] sm:$0xff] }
 0x200   :  { %658 = vmatpush.msra.mxu2 %v1356_v38  ;;  %708 = vmatpush.msra.mxu3 %v1375_v39  ;;  %v1430_v38 = vld [vmem:[%s2290_s4 + $0x438] sm:$0xff] }
 0x202   :  { %659 = vmatpush.msra.mxu2 %v1354_v41  ;;  %709 = vmatpush.msra.mxu3 %v1373_v42  ;;  %v1428_v41 = vld [vmem:[%s2290_s4 + $0x428] sm:$0xff]  ;;  %v1423_v42 = vld [vmem:[%s2290_s4 + $0x400] sm:$0xff] }
 0x204   :  { %v287_v48 = vpop.f32.mrf.mxu1  ;;  %660 = vmatpush.msra.mxu2 %v1352_v44  ;;  %710 = vmatpush.msra.mxu3 %v1371_v45  ;;  %v1424_v44 = vld [vmem:[%s2290_s4 + $0x408] sm:$0xff] }
 0x205   :  { %1320 = vmatmul.msk.f32.gmra.mxu2 %vm194_vm1, %v281_v24  ;;  %1322 = vmatmul.msk.f32.gmra.mxu3 %vm194_vm1, %v281_v24  ;;  %v1438_v24 = vld [vmem:[%s2290_s4 + $0x478] sm:$0xff] }
 0x206   :  { %661 = vmatpush.msra.mxu2 %v1350_v46  ;;  %711 = vmatpush.msra.mxu3 %v1369_v47 }
 0x208   :  { %662 = vmatpush.msra.mxu2 %v1348_v50  ;;  %712 = vmatpush.msra.mxu3 %v1367_v51 }
 0x20a   :  { %663 = vmatpush.msra.mxu2 %v1346_v52  ;;  %713 = vmatpush.msra.mxu3 %v1365_v53 }
 0x20c   :  { %v290_v57 = vpop.f32.mrf.mxu1  ;;  %664 = vmatpush.msra.mxu2 %v1344_v54  ;;  %714 = vmatpush.msra.mxu3 %v1363_v55 }
 0x20d   :  { %1339 = vmatmul.msk.f32.vlgmr.msrb.gmra.mxu2 %vm194_vm1, %v284_v36  ;;  %1341 = vmatmul.msk.f32.vlgmr.msrb.gmra.mxu3 %vm194_vm1, %v284_v36  ;;  %v1406_v36 = vld [vmem:[%s2290_s4 + $0x398] sm:$0xff] }
 0x20e   :  { %1359 = vmatmul.msk.f32.vlgmr.msrb.gmra.mxu0 %vm194_vm1, %v290_v57  ;;  %780 = vmatpush.msrb.mxu2 %v1397_v56 }
 0x20f   :  { %803 = vmatpush.msrb.mxu3 %v1398_v58  ;;  %853 = vmatpush.msrb.mxu0 %v1417_v60 }
 0x210   :  { %781 = vmatpush.msrb.mxu2 %v1395_v59 }
 0x211   :  { %804 = vmatpush.msrb.mxu3 %v1396_v61  ;;  %854 = vmatpush.msrb.mxu0 %v1415_v62 }
 0x212   :  { %782 = vmatpush.msrb.mxu2 %v1393_v63 }
 0x213   :  { %805 = vmatpush.msrb.mxu3 %v1394_v0  ;;  %855 = vmatpush.msrb.mxu0 %v1413_v1 }
 0x214   :  { %v293_v4 = vpop.f32.mrf.mxu1  ;;  %783 = vmatpush.msrb.mxu2 %v1391_v2 }
 0x215   :  { %1340 = vmatmul.msk.f32.gmra.mxu2 %vm194_vm1, %v287_v48  ;;  %1342 = vmatmul.msk.f32.gmra.mxu3 %vm194_vm1, %v287_v48 }
 0x216   :  { %1360 = vmatmul.msk.f32.gmra.mxu0 %vm194_vm1, %v293_v4  ;;  %806 = vmatpush.msrb.mxu3 %v1392_v3 }
 0x217   :  { %784 = vmatpush.msrb.mxu2 %v1389_v5  ;;  %856 = vmatpush.msrb.mxu0 %v1411_v6 }
 0x218   :  { %807 = vmatpush.msrb.mxu3 %v1390_v7 }
 0x219   :  { %785 = vmatpush.msrb.mxu2 %v1387_v8  ;;  %857 = vmatpush.msrb.mxu0 %v1409_v9 }
 0x21a   :  { %808 = vmatpush.msrb.mxu3 %v1388_v10 }
 0x21b   :  { %786 = vmatpush.msrb.mxu2 %v1385_v11  ;;  %858 = vmatpush.msrb.mxu0 %v1407_v12 }
 0x21c   :  { %v296_v15 = vpop.f32.mrf.mxu1  ;;  %809 = vmatpush.msrb.mxu3 %v1386_v13 }
 0x21d   :  { %1361 = vmatmul.msk.f32.vlgmr.msra.gmra.mxu2 %vm194_vm1, %v290_v57  ;;  %1379 = vmatmul.msk.f32.vlgmr.msra.gmra.mxu3 %vm194_vm1, %v296_v15 }
 0x21e   :  { %1381 = vmatmul.msk.f32.vlgmr.msra.gmra.mxu0 %vm194_vm1, %v296_v15  ;;  %787 = vmatpush.msrb.mxu2 %v1383_v14 }
 0x21f   :  { %810 = vmatpush.msrb.mxu3 %v1384_v16  ;;  %859 = vmatpush.msrb.mxu0 %v1405_v18 }
 0x220   :  { %876 = vmatpush.msra.mxu2 %v1418_v17 }
 0x221   :  { %926 = vmatpush.msra.mxu3 %v1437_v19  ;;  %860 = vmatpush.msrb.mxu0 %v1403_v21 }
 0x222   :  { %877 = vmatpush.msra.mxu2 %v1416_v20 }
 0x223   :  { %927 = vmatpush.msra.mxu3 %v1435_v22  ;;  %949 = vmatpush.msra.mxu0 %v1438_v24  ;;  %v1022_v24 = vld [vmem:[%s2292_s6 + $0x70] sm:$0xff] }
 0x224   :  { %878 = vmatpush.msra.mxu2 %v1414_v23  ;;  %v299_v27 = vpop.f32.mrf.mxu1  ;;  %v1023_v23 = vld [vmem:[%s2292_s6 + $0x78] sm:$0xff] }
 0x225   :  { %928 = vmatpush.msra.mxu3 %v1433_v25  ;;  %1362 = vmatmul.msk.f32.gmra.mxu2 %vm194_vm1, %v293_v4 }
 0x226   :  { %1380 = vmatmul.msk.f32.gmra.mxu3 %vm194_vm1, %v299_v27  ;;  %1382 = vmatmul.msk.f32.gmra.mxu0 %vm194_vm1, %v299_v27  ;;  %v1021_v27 = vld [vmem:[%s2292_s6 + $0x68] sm:$0xff] }
 0x227   :  { %879 = vmatpush.msra.mxu2 %v1412_v26  ;;  %950 = vmatpush.msra.mxu0 %v1436_v28 }
 0x228   :  { %929 = vmatpush.msra.mxu3 %v1431_v29 }
 0x229   :  { %880 = vmatpush.msra.mxu2 %v1410_v30  ;;  %951 = vmatpush.msra.mxu0 %v1434_v31  ;;  %v1020_v30 = vld [vmem:[%s2292_s6 + $0x60] sm:$0xff] }
 0x22a   :  { %930 = vmatpush.msra.mxu3 %v1429_v32 }
 0x22b   :  { %881 = vmatpush.msra.mxu2 %v1408_v33  ;;  %952 = vmatpush.msra.mxu0 %v1432_v34 }
 0x22c   :  { %931 = vmatpush.msra.mxu3 %v1427_v35  ;;  %v302_v39 = vpop.f32.mrf.mxu1 }
 0x22d   :  { %882 = vmatpush.msra.mxu2 %v1406_v36  ;;  %953 = vmatpush.msra.mxu0 %v1430_v38  ;;  %v1019_v36 = vld [vmem:[%s2292_s6 + $0x58] sm:$0xff] }
 0x22e   :  { %1399 = vmatmul.msk.f32.vlgmr.msrb.gmra.mxu2 %vm194_vm1, %v302_v39  ;;  %1401 = vmatmul.msk.f32.vlgmr.msrb.gmra.mxu3 %vm194_vm1, %v302_v39 }
 0x22f   :  { %883 = vmatpush.msra.mxu2 %v1404_v37  ;;  %932 = vmatpush.msra.mxu3 %v1425_v40 }
 0x230   :  { %954 = vmatpush.msra.mxu0 %v1428_v41  ;;  %v968_v41 = vld [vmem:[%s2291_s5] sm:$0x3] }
 0x231   :  { %933 = vmatpush.msra.mxu3 %v1423_v42  ;;  %v1018_v42 = vld [vmem:[%s2292_s6 + $0x50] sm:$0xff] }
 0x232   :  { %955 = vmatpush.msra.mxu0 %v1426_v43 }
 0x233   :  { %1025 = vmatpush.msrb.mxu3 %v1023_v23  ;;  %v1050_v23 = vld [vmem:[%s2294_s8 + $0x20] sm:$0xff] }
 0x234   :  { %v305_v45 = vpop.f32.mrf.mxu1  ;;  %956 = vmatpush.msra.mxu0 %v1424_v44 }
 0x235   :  { %1026 = vmatpush.msrb.mxu3 %v1022_v24  ;;  %v1049_v24 = vld [vmem:[%s2294_s8 + $0x18] sm:$0xff] }
 0x236   :  { %1400 = vmatmul.msk.f32.gmra.mxu2 %vm194_vm1, %v305_v45  ;;  %1402 = vmatmul.msk.f32.gmra.mxu3 %vm194_vm1, %v305_v45 }
 0x237   :  { %1027 = vmatpush.msrb.mxu3 %v1021_v27  ;;  %v1047_v27 = vld [vmem:[%s2294_s8 + $0x8] sm:$0xff] }
 0x239   :  { %1028 = vmatpush.msrb.mxu3 %v1020_v30 }
 0x23b   :  { %1029 = vmatpush.msrb.mxu3 %v1019_v36 }
 0x23c   :  { %v308_v46 = vpop.f32.mrf.mxu1 }
 0x23d   :  { %1419 = vmatmul.msk.f32.vlgmr.msrb.gmra.mxu0 %vm194_vm1, %v308_v46  ;;  %1030 = vmatpush.msrb.mxu3 %v1018_v42 }
 0x23e   :  { %1421 = vmatmul.msk.f32.vlgmr.msra.gmra.mxu2 %vm194_vm1, %v308_v46  ;;  %v970_v46 = vperm.slane %v968_v41, 0 }
 0x244   :  { %v311_v47 = vpop.f32.mrf.mxu1 }
 0x245   :  { %1420 = vmatmul.msk.f32.gmra.mxu0 %vm194_vm1, %v311_v47 }
 0x246   :  { %1422 = vmatmul.msk.f32.gmra.mxu2 %vm194_vm1, %v311_v47 }
 0x24c   :  { %v314_v48 = vpop.f32.mrf.mxu1 }
 0x24d   :  { %1439 = vmatmul.msk.f32.vlgmr.msra.gmra.mxu3 %vm194_vm1, %v314_v48  ;;  %1441 = vmatmul.msk.f32.vlgmr.msra.gmra.mxu0 %vm194_vm1, %v314_v48  ;;  %v1017_v48 = vld [vmem:[%s2292_s6 + $0x48] sm:$0xff] }
 0x24e   :  { %1031 = vmatpush.msrb.mxu3 %v1017_v48 }
 0x254   :  { %v317_v49 = vpop.f32.mrf.mxu1 }
 0x255   :  { %1440 = vmatmul.msk.f32.gmra.mxu3 %vm194_vm1, %v317_v49  ;;  %1442 = vmatmul.msk.f32.gmra.mxu0 %vm194_vm1, %v317_v49 }
 0x260   :  { %v376_v50 = vpop.f32.mrf.mxu2  ;;  %v399_v51 = vpop.f32.mrf.mxu3 }
 0x268   :  { %v379_v52 = vpop.f32.mrf.mxu2  ;;  %v402_v53 = vpop.f32.mrf.mxu3 }
 0x270   :  { %v428_v54 = vpop.f32.mrf.mxu2  ;;  %v451_v55 = vpop.f32.mrf.mxu3 }
 0x271   :  { %v429_v56 = vadd.f32 %v428_v54, %v376_v50  ;;  %v452_v57 = vadd.f32 %v451_v55, %v399_v51  ;;  %v971_v51 = vperm.slane %v968_v41, 1 }
 0x278   :  { %v431_v58 = vpop.f32.mrf.mxu2  ;;  %v454_v59 = vpop.f32.mrf.mxu3 }
 0x279   :  { %v432_v60 = vadd.f32 %v431_v58, %v379_v52  ;;  %v455_v61 = vadd.f32 %v454_v59, %v402_v53  ;;  %v1016_v53 = vld [vmem:[%s2292_s6 + $0x40] sm:$0xff]  ;;  %v1015_v58 = vld [vmem:[%s2292_s6 + $0x38] sm:$0xff] }
 0x27a   :  { %1032 = vmatpush.msrb.mxu3 %v1016_v53 }
 0x27c   :  { %1033 = vmatpush.msrb.mxu3 %v1015_v58  ;;  %v1491_v58 = vmov 920167782  }
 0x280   :  { %v497_v62 = vpop.f32.mrf.mxu2  ;;  %v520_v63 = vpop.f32.mrf.mxu3 }
 0x281   :  { %v527_v0 = vadd.f32 %v520_v63, %v452_v57  ;;  %v526_v20 = vadd.f32 %v497_v62, %v429_v56 }
 0x288   :  { %v500_v1 = vpop.f32.mrf.mxu2  ;;  %v523_v2 = vpop.f32.mrf.mxu3 }
 0x289   :  { %v528_v31 = vadd.f32 %v500_v1, %v432_v60  ;;  %v529_v32 = vadd.f32 %v523_v2, %v455_v61 }
 0x28b   :  { %v643_v4 = vpop.f32.mrf.mxu0 }
 0x290   :  { %v570_v3 = vpop.f32.mrf.mxu2  ;;  %v593_v5 = vpop.f32.mrf.mxu3 }
 0x291   :  { %v599_v21 = vadd.f32 %v570_v3, %v526_v20  ;;  %v600_v22 = vadd.f32 %v593_v5, %v527_v0  ;;  %v1014_v0 = vld [vmem:[%s2292_s6 + $0x30] sm:$0xff]  ;;  %v1013_v5 = vld [vmem:[%s2292_s6 + $0x28] sm:$0xff]  ;;  %v1053_v20 = vld [vmem:[%s2294_s8 + $0x38] sm:$0xff] }
 0x292   :  { %1034 = vmatpush.msrb.mxu3 %v1014_v0  ;;  %1066 = vmatpush.msrb.mxu0 %v1053_v20 }
 0x293   :  { %v646_v7 = vpop.f32.mrf.mxu0  ;;  %v672_v28 = vadd.f32 %v643_v4, %v599_v21  ;;  %v1052_v21 = vld [vmem:[%s2294_s8 + $0x30] sm:$0xff] }
 0x294   :  { %1035 = vmatpush.msrb.mxu3 %v1013_v5  ;;  %1067 = vmatpush.msrb.mxu0 %v1052_v21 }
 0x298   :  { %v573_v6 = vpop.f32.mrf.mxu2  ;;  %v596_v8 = vpop.f32.mrf.mxu3 }
 0x299   :  { %v601_v37 = vadd.f32 %v573_v6, %v528_v31  ;;  %v602_v38 = vadd.f32 %v596_v8, %v529_v32  ;;  %v1012_v8 = vld [vmem:[%s2292_s6 + $0x20] sm:$0xff] }
 0x29a   :  { %1036 = vmatpush.msrb.mxu3 %v1012_v8 }
 0x29b   :  { %v739_v10 = vpop.f32.mrf.mxu0  ;;  %v674_v49 = vadd.f32 %v646_v7, %v601_v37 }
 0x2a0   :  { %v666_v9 = vpop.f32.mrf.mxu2  ;;  %v716_v11 = vpop.f32.mrf.mxu3 }
 0x2a1   :  { %v673_v25 = vadd.f32 %v666_v9, %v600_v22  ;;  %v745_v33 = vadd.f32 %v716_v11, %v672_v28  ;;  %v1051_v22 = vld [vmem:[%s2294_s8 + $0x28] sm:$0xff]  ;;  %v1046_v28 = vld [vmem:[%s2294_s8] sm:$0xff] }
 0x2a2   :  { %1068 = vmatpush.msrb.mxu0 %v1051_v22 }
 0x2a3   :  { %v742_v13 = vpop.f32.mrf.mxu0  ;;  %v746_v34 = vadd.f32 %v739_v10, %v673_v25  ;;  %v1011_v10 = vld [vmem:[%s2292_s6 + $0x18] sm:$0xff] }
 0x2a4   :  { %1037 = vmatpush.msrb.mxu3 %v1011_v10  ;;  %1069 = vmatpush.msrb.mxu0 %v1050_v23 }
 0x2a6   :  { %1070 = vmatpush.msrb.mxu0 %v1049_v24 }
 0x2a8   :  { %v669_v12 = vpop.f32.mrf.mxu2 }
 0x2a9   :  { %v719_v14 = vpop.f32.mrf.mxu3  ;;  %v675_v43 = vadd.f32 %v669_v12, %v602_v38 }
 0x2aa   :  { %v747_v54 = vadd.f32 %v719_v14, %v674_v49  ;;  %v1488_v49 = vmov 2475754826  }
 0x2ab   :  { %v748_v55 = vadd.f32 %v742_v13, %v675_v43  ;;  %v1010_v13 = vld [vmem:[%s2292_s6 + $0x10] sm:$0xff] }
 0x2ac   :  { %1038 = vmatpush.msrb.mxu3 %v1010_v13 }
 0x2b1   :  { %v789_v15 = vpop.f32.mrf.mxu2  ;;  %v812_v17 = vpop.f32.mrf.mxu3 }
 0x2b2   :  { %v818_v39 = vadd.f32 %v789_v15, %v745_v33  ;;  %v819_v40 = vadd.f32 %v812_v17, %v746_v34  ;;  %v1009_v15 = vld [vmem:[%s2292_s6 + $0x8] sm:$0xff]  ;;  %v1054_v33 = vld [vmem:[#allocation2] sm:$0x1] }
 0x2b3   :  { %1039 = vmatpush.msrb.mxu3 %v1009_v15 }
 0x2b9   :  { %v792_v18 = vpop.f32.mrf.mxu2  ;;  %v815_v26 = vpop.f32.mrf.mxu3 }
 0x2ba   :  { %v862_v16 = vpop.f32.mrf.mxu0  ;;  %v820_v59 = vadd.f32 %v792_v18, %v747_v54  ;;  %v821_v60 = vadd.f32 %v815_v26, %v748_v55  ;;  %v1486_v18 = vmov 0.0625   ;;  %v1048_v26 = vld [vmem:[%s2294_s8 + $0x10] sm:$0xff]  ;;  %v1490_v55 = vmov 2102212464  }
 0x2bb   :  { %v891_v44 = vadd.f32 %v862_v16, %v818_v39  ;;  %1071 = vmatpush.msrb.mxu0 %v1048_v26 }
 0x2bd   :  { %1072 = vmatpush.msrb.mxu0 %v1047_v27 }
 0x2bf   :  { %1073 = vmatpush.msrb.mxu0 %v1046_v28 }
 0x2c1   :  { %v885_v29 = vpop.f32.mrf.mxu2 }
 0x2c2   :  { %v865_v19 = vpop.f32.mrf.mxu0  ;;  %v892_v45 = vadd.f32 %v885_v29, %v819_v40  ;;  %v1024_v29 = vld [vmem:[%s2293_s7] sm:$0x1]  ;;  %s1494_s7 = smov [#allocation3]  }
 0x2c3   :  { %v893_v1 = vadd.f32 %v865_v19, %v820_v59  ;;  %v1008_v19 = vld [vmem:[%s2292_s6] sm:$0xff]  ;;  %s1242_s8 = sshll.u32 %s1494_s7, 4  ;;  %s1243_s8 = int_to_ptr.vmem [resolvable:$true] %s1242_s8 }
 0x2c4   :  { %1040 = vmatpush.msrb.mxu3 %v1008_v19 }
 0x2c9   :  { %v888_v57 = vpop.f32.mrf.mxu2 }
 0x2ca   :  { %v958_v35 = vpop.f32.mrf.mxu0  ;;  %v894_v2 = vadd.f32 %v888_v57, %v821_v60 }
 0x2cb   :  { %v965_v50 = vadd.f32 %v958_v35, %v892_v45 }
 0x2cd   :  { %v975_v61 = vadd.f32 %v971_v51, %v965_v50 }
 0x2d0   :  { %v935_v47 = vpop.f32.mrf.mxu3 }
 0x2d1   :  { %v964_v52 = vadd.f32 %v935_v47, %v891_v44  ;;  %v1487_v47 = vmov 683565275  }
 0x2d2   :  { %v961_v63 = vpop.f32.mrf.mxu0 }
 0x2d3   :  { %v974_v56 = vadd.f32 %v970_v46, %v964_v52  ;;  %v967_v6 = vadd.f32 %v961_v63, %v894_v2  ;;  %v1489_v52 = vmov 2131351028  }
 0x2d5   :  { %v978_v62 = vmax.f32 %v974_v56, 0.0  ;;  %v977_v11 = vadd.f32 %v971_v51, %v967_v6 }
 0x2d7   :  { %v980_v3 = vadd.f32 %v978_v62, %v975_v61  ;;  %v1492_v61 = vmov 1326507024  }
 0x2d8   :  { %v938_v4 = vpop.f32.mrf.mxu3 }
 0x2d9   :  { %v966_v7 = vadd.f32 %v938_v4, %v893_v1  ;;  %v982_v17 = vmax.f32 %v980_v3, 0.0 }
 0x2db   :  { %v976_v9 = vadd.f32 %v970_v46, %v966_v7 }
 0x2dd   :  { %v979_v12 = vmax.f32 %v976_v9, 0.0 }
 0x2df   :  { %v981_v14 = vadd.f32 %v979_v12, %v977_v11 }
 0x2e1   :  { %v983_v16 = vmax.f32 %v981_v14, 0.0 }
 0x2e3   :  { %1002 = vmatpush.msrb.mxu2 %v983_v16 }
 0x2e5   :  { %1003 = vmatpush.msrb.mxu2 %v982_v17 }
 0x2e6   :  { %1443 = vmatmul.msk.f32.vlgmr.msrb.gmra.mxu2 %vm984_vm2, %v1486_v18 }
 0x369   :  { %v1005_v25 = vpop.f32.mrf.mxu2 }
 0x36a   :  { %1041 = vmatmul.f32.vlgmr.msrb.gmra.mxu3 %v1005_v25 }
 0x3ed   :  { %v1042_v30 = vpop.f32.mrf.mxu3 }
 0x3ee   :  { %v1043_v31 = vadd.f32 %v1042_v30, %v1024_v29 }
 0x3f0   :  { %v1045_v32 = vmax.f32 %v1043_v31, 0.0  ;;  %v1493_v31 = vmov 0  }
 0x3f2   :  { %1444 = vmatmul.msk.f32.vlgmr.msrb.gmra.mxu0 %vm194_vm1, %v1045_v32 }
 0x46f   :  { %v1075_v34 = vpop.f32.mrf.mxu0 }
 0x470   :  { %v2227_v35 = vadd.f32 %v1075_v34, %v1054_v33 }
 0x472   :  { %v1081_v36 = vand.u32 2139095040, %v2227_v35  ;;  %v1078_v39 = vand.u32 2147483647, %v2227_v35  ;;  %vm1080_vm15 = vcmp.lt.s32.totalorder %v2227_v35, 0 }
 0x474   :  { %v1082_v37 = vshrl.u32 %v1081_v36, 23  ;;  %v1085_v41 = vand.u32 8388607, %v1078_v39  ;;  %vm1079_vm0 = vcmp.le.f32.partialorder %v1078_v39, 0.7853982 }
 0x476   :  { %v1445_v38 = vadd.s32 4294967169, %v1082_v37  ;;  %v1086_v45 = vor.u32 8388608, %v1085_v41 }
 0x478   :  { %v1088_v40 = vadd.s32 1, %v1445_v38  ;;  %v2244_v4 = vshll.u32 %v1086_v45, 8 }
 0x47a   :  { %vm1089_vm3 = vcmp.gt.s32.totalorder %v1088_v40, 0  ;;  %v1127_v13 = vand.u32 65535, %v2244_v4  ;;  %v1128_v14 = vshrl.u32 %v2244_v4, 16 }
 0x47b   :  { %v1090_v42 = vsel %vm1089_vm3, %v1088_v40, 0 }
 0x47c   :  { %v1092_v43 = vand.u32 31, %v1090_v42  ;;  %v2235_v46 = vshrl.u32 %v1090_v42, 5 }
 0x47e   :  { %v2233_v44 = vsub.s32 32, %v1092_v43  ;;  %v1095_v48 = vshll.u32 %v1487_v47, %v1092_v43  ;;  %v1098_v50 = vshll.u32 %v1488_v49, %v1092_v43  ;;  %v1101_v54 = vshll.u32 %v1489_v52, %v1092_v43 }
 0x47f   :  { %v1104_v57 = vshll.u32 %v1490_v55, %v1092_v43  ;;  %v1107_v60 = vshll.u32 %v1491_v58, %v1092_v43  ;;  %vm1110_vm4 = vcmp.lt.s32.totalorder %v2235_v46, 1  ;;  %vm1113_vm5 = vcmp.lt.s32.totalorder %v2235_v46, 4 }
 0x480   :  { %v1096_v51 = vshrl.u32 %v1488_v49, %v2233_v44  ;;  %v1099_v53 = vshrl.u32 %v1489_v52, %v2233_v44  ;;  %v1102_v56 = vshrl.u32 %v1490_v55, %v2233_v44  ;;  %v1105_v59 = vshrl.u32 %v1491_v58, %v2233_v44 }
 0x481   :  { %v1108_v62 = vshrl.u32 %v1492_v61, %v2233_v44  ;;  %vm1112_vm6 = vcmp.lt.s32.totalorder %v2235_v46, 3  ;;  %vm1111_vm7 = vcmp.lt.s32.totalorder %v2235_v46, 2  ;;  %v1094_v42 = vshrl.u32 %v1487_v47, %v2233_v44 }
 0x482   :  { %v1097_v63 = vor.u32 %v1096_v51, %v1095_v48  ;;  %v1100_v0 = vor.u32 %v1099_v53, %v1098_v50  ;;  %v1103_v1 = vor.u32 %v1102_v56, %v1101_v54  ;;  %v1106_v2 = vor.u32 %v1105_v59, %v1104_v57 }
 0x483   :  { %v1109_v3 = vor.u32 %v1108_v62, %v1107_v60 }
 0x484   :  { %v1118_v5 = vsel %vm1110_vm4, %v1097_v63, %v1100_v0  ;;  %v1122_v6 = vsel %vm1110_vm4, %v1100_v0, %v1103_v1  ;;  %v1119_v7 = vsel %vm1113_vm5, %v1106_v2, 920167782  ;;  %v1115_v38 = vsel %vm1113_vm5, %v1103_v1, 2102212464 }
 0x485   :  { %v1123_v8 = vsel %vm1113_vm5, %v1109_v3, 1326507024  ;;  %v1120_v9 = vsel %vm1112_vm6, %v1103_v1, %v1119_v7  ;;  %v1114_v51 = vsel %vm1110_vm4, %v1094_v42, %v1097_v63  ;;  %v1116_v52 = vsel %vm1112_vm6, %v1100_v0, %v1115_v38 }
 0x486   :  { %v1124_v10 = vsel %vm1112_vm6, %v1106_v2, %v1123_v8  ;;  %v1121_v11 = vsel %vm1111_vm7, %v1118_v5, %v1120_v9  ;;  %v1117_v44 = vsel %vm1111_vm7, %v1114_v51, %v1116_v52  ;;  %vm1221_vm4 = vweird.f32 %v2227_v35 }
 0x487   :  { %v1125_v12 = vsel %vm1111_vm7, %v1122_v6, %v1124_v10  ;;  %v1151_v17 = vand.u32 65535, %v1121_v11  ;;  %v1152_v18 = vshrl.u32 %v1121_v11, 16  ;;  %v1171_v60 = vmul.u32 %v2244_v4, %v1117_v44 }
 0x488   :  { %v1129_v15 = vand.u32 65535, %v1125_v12  ;;  %v1130_v16 = vshrl.u32 %v1125_v12, 16  ;;  %vm1235_vm5 = vcmask 0  }
 0x489   :  { %v1154_v21 = vmul.u32 %v1152_v18, %v1127_v13  ;;  %v1155_v22 = vmul.u32 %v1151_v17, %v1128_v14  ;;  %v1153_v26 = vmul.u32 %v1151_v17, %v1127_v13  ;;  %v1156_v30 = vmul.u32 %v1152_v18, %v1128_v14 }
 0x48a   :  { %v1132_v19 = vmul.u32 %v1130_v16, %v1127_v13  ;;  %v1133_v20 = vmul.u32 %v1129_v15, %v1128_v14  ;;  %v1131_v23 = vmul.u32 %v1129_v15, %v1127_v13  ;;  %v1134_v25 = vmul.u32 %v1130_v16, %v1128_v14 }
 0x48b   :  { %v1157_v27 = vshll.u32 %v1154_v21, 16  ;;  %v1159_v33 = vshll.u32 %v1155_v22, 16  ;;  %v1158_v49 = vshrl.u32 %v1154_v21, 16  ;;  %v1160_v55 = vshrl.u32 %v1155_v22, 16 }
 0x48c   :  { %v1135_v24 = vshll.u32 %v1132_v19, 16  ;;  %v1137_v28 = vshll.u32 %v1133_v20, 16  ;;  %v1136_v43 = vshrl.u32 %v1132_v19, 16  ;;  %v1138_v53 = vshrl.u32 %v1133_v20, 16 }
 0x48d   :  { %vm1161_vm9 = vc.u32 %v1153_v26, %v1157_v27  ;;  %v1163_v34 = vadd.s32 %v1157_v27, %v1153_v26 }
 0x48e   :  { %vm1139_vm8 = vc.u32 %v1131_v23, %v1135_v24  ;;  %v1141_v29 = vadd.s32 %v1135_v24, %v1131_v23  ;;  %v1162_v37 = vsel %vm1161_vm9, 1, %v1493_v31 }
 0x48f   :  { %v1140_v32 = vsel %vm1139_vm8, 1, %v1493_v31  ;;  %v1164_v41 = vadd.s32 %v1162_v37, %v1156_v30  ;;  %vm1165_vm11 = vc.u32 %v1163_v34, %v1159_v33  ;;  %v1167_v58 = vadd.s32 %v1163_v34, %v1159_v33 }
 0x490   :  { %v1142_v36 = vadd.s32 %v1140_v32, %v1134_v25  ;;  %vm1143_vm10 = vc.u32 %v1141_v29, %v1137_v28  ;;  %v1166_v48 = vsel %vm1165_vm11, 1, %v1493_v31 }
 0x491   :  { %v1144_v40 = vsel %vm1143_vm10, 1, %v1493_v31  ;;  %v1168_v50 = vadd.s32 %v1166_v48, %v1164_v41 }
 0x492   :  { %v1146_v45 = vadd.s32 %v1144_v40, %v1142_v36 }
 0x493   :  { %v1169_v56 = vadd.s32 %v1168_v50, %v1158_v49 }
 0x494   :  { %v1147_v54 = vadd.s32 %v1146_v45, %v1136_v43 }
 0x495   :  { %v1170_v47 = vadd.s32 %v1169_v56, %v1160_v55 }
 0x496   :  { %v1148_v57 = vadd.s32 %v1147_v54, %v1138_v53 }
 0x497   :  { %v1174_v59 = vadd.s32 1, %v1170_v47 }
 0x498   :  { %vm1173_vm12 = vc.u32 %v1148_v57, %v1167_v58  ;;  %v1172_v46 = vadd.s32 %v1167_v58, %v1148_v57 }
 0x499   :  { %v1175_v61 = vsel %vm1173_vm12, %v1174_v59, %v1170_v47 }
 0x49a   :  { %v1176_v62 = vadd.s32 %v1175_v61, %v1171_v60 }
 0x49c   :  { %v1177_v63 = vadd.s32 536870912, %v1176_v62 }
 0x49e   :  { %v1178_v1 = vshrl.u32 %v1177_v63, 30 }
 0x4a0   :  { %v1179_v2 = vshll.u32 %v1178_v1, 30  ;;  %v1202_v21 = vsub.s32 4, %v1178_v1 }
 0x4a2   :  { %v1180_v0 = vsub.s32 %v1176_v62, %v1179_v2  ;;  %v1203_v26 = vsel %vm1080_vm15, %v1202_v21, %v1178_v1 }
 0x4a3   :  { %v1205_v29 = vsel %vm1079_vm0, 0, %v1203_v26 }
 0x4a4   :  { %vm1181_vm13 = vcmp.lt.s32.totalorder %v1180_v0, 0  ;;  %v1182_v3 = vsub.s32 0, %v1180_v0  ;;  %v1222_v34 = vadd.s32 3, %v1205_v29 }
 0x4a6   :  { %v1183_v5 = vsel %vm1181_vm13, %v1182_v3, %v1180_v0  ;;  %v1223_v40 = vand.u32 3, %v1222_v34 }
 0x4a7   :  { %v1184_v6 = vclz %v1183_v5 }
 0x4a8   :  { %vm1225_vm1 = vcmp.eq.s32.totalorder %v1223_v40, 0  ;;  %vm1228_vm2 = vcmp.eq.s32.totalorder %v1223_v40, 2  ;;  %vm1224_vm3 = vcmp.lt.s32.totalorder %v1223_v40, 2 }
 0x4a9   :  { %v1446_v7 = vadd.s32 4294967294, %v1184_v6 }
 0x4ab   :  { %vm1447_vm14 = vcmp.lt.s32.totalorder %v1446_v7, 0 }
 0x4ac   :  { %v1187_v8 = vsel %vm1447_vm14, 0, %v1446_v7 }
 0x4ad   :  { %v1188_v9 = vsub.s32 32, %v1187_v8  ;;  %v1192_v10 = vsub.s32 4294967266, %v1187_v8  ;;  %v1189_v11 = vshll.u32 %v1180_v0, %v1187_v8 }
 0x4af   :  { %v1190_v12 = vshrl.u32 %v1172_v46, %v1188_v9  ;;  %v1193_v13 = vadd.s32 127, %v1192_v10 }
 0x4b1   :  { %v1191_v4 = vor.u32 %v1190_v12, %v1189_v11  ;;  %v1194_v14 = vshll.u32 %v1193_v13, 23 }
 0x4b3   :  { %v1195_v15 = vor.u32 4788187, %v1194_v14  ;;  %v1198_v17 = vcvt.s32.f32 %v1191_v4 }
 0x4b5   :  { %v1196_v16 = vand.u32 2147483647, %v1195_v15 }
 0x4b7   :  { %v1199_v18 = vmul.f32 %v1198_v17, %v1196_v16 }
 0x4b9   :  { %v1200_v19 = vxor.u32 2147483648, %v1199_v18 }
 0x4bb   :  { %v1201_v20 = vsel %vm1080_vm15, %v1200_v19, %v1199_v18 }
 0x4bc   :  { %v1204_v22 = vsel %vm1079_vm0, %v2227_v35, %v1201_v20 }
 0x4bd   :  { %v1206_v23 = vmul.f32 %v1204_v22, %v1204_v22 }
 0x4bf   :  { %v1207_v24 = vmul.f32 -0.001358992, %v1206_v23  ;;  %v1214_v25 = vmul.f32 -0.00019511016, %v1206_v23 }
 0x4c1   :  { %v1208_v27 = vadd.f32 0.041655596, %v1207_v24  ;;  %v1215_v28 = vadd.f32 0.008332121, %v1214_v25 }
 0x4c3   :  { %v1209_v30 = vmul.f32 %v1208_v27, %v1206_v23  ;;  %v1216_v31 = vmul.f32 %v1215_v28, %v1206_v23 }
 0x4c5   :  { %v1210_v32 = vadd.f32 -0.4999988, %v1209_v30  ;;  %v1217_v33 = vadd.f32 -0.16666654, %v1216_v31 }
 0x4c7   :  { %v1211_v36 = vmul.f32 %v1210_v32, %v1206_v23  ;;  %v1218_v37 = vmul.f32 %v1217_v33, %v1206_v23 }
 0x4c9   :  { %v1212_v38 = vadd.f32 1.0, %v1211_v36  ;;  %v1219_v39 = vadd.f32 1.0, %v1218_v37 }
 0x4cb   :  { %v1220_v41 = vmul.f32 %v1219_v39, %v1204_v22  ;;  %v1229_v42 = vxor.u32 2147483648, %v1212_v38 }
 0x4cd   :  { %v1226_v43 = vxor.u32 2147483648, %v1220_v41  ;;  %v1230_v48 = vsel %vm1228_vm2, %v1229_v42, %v1220_v41 }
 0x4cf   :  { %v1227_v45 = vsel %vm1225_vm1, %v1212_v38, %v1226_v43 }
 0x4d0   :  { %v1231_v49 = vsel %vm1224_vm3, %v1227_v45, %v1230_v48 }
 0x4d1   :  { %v1232_v50 = vsel %vm1221_vm4, nan, %v1231_v49 }
 0x4d2   :  { %v1233_v51 = vadd.f32 1.0, %v1232_v50 }
 0x4d4   :  { %v1234_v52 = vmul.f32 0.5, %v1233_v51 }
 0x4d6   :  { %1236 = vst.msk [vmem:[#allocation3] sm:$0x1] %vm1235_vm5, %v1234_v52 }
 0x4d7   :  { %1247 = dma.vmem_to_hbm [thread:$0]  %s1243_s8, 16, %s1245_s20, [#allocation4]  }
 0x4d8   :  { %1483 = dma.done.wait [#allocation4], 16  }
 0x4d9   :  { %1484 = vsyncadd [#allocation4], 4294967280 }
 0x4da   :  { %1252 = vsyncpa [#allocation4], 1 }

</bundles_post_ra>
